<compile_context>
chip_gen: v7x
topology: tpu7x:2x2x1
jax: 0.10.0
libtpu: 0.0.40
codegen_flags: <defaults>
</compile_context>

<pallas_src>
import math

import jax
import jax.numpy as jnp
from jax.experimental import pallas as pl
from jax.experimental.pallas import tpu as pltpu

D_IN = 28 * 28      # 784
D_H = 512
D_OUT = 10
D_OUT_PAD = 128     # lane-dense logits / output store
BN_EPS = 1e-5
NEG_INF = -1e30     # bias for padded logit columns -> exp underflows to exactly 0


def _round_up(x, m):
    return (x + m - 1) // m * m


def mlp_kernel(x_ref,
               w1_ref, b1_ref,
               w2_ref, b2_ref,
               w3_ref, b3_ref,
               w4_ref, b4_ref,
               o_ref):
    """One batch tile of the full MLP (BatchNorm folded into W/b; Dropout = identity in eval)."""
    # x arrives f32 from HBM; cast to bf16 here (VPU, hidden under MXU) for the bf16 MXU path.
    x = x_ref[...].astype(jnp.bfloat16)

    # Hidden layers: Linear(+folded BN) -> ReLU.  bf16 operands, f32 MXU accumulation.
    h = jnp.dot(x, w1_ref[...], preferred_element_type=jnp.float32) + b1_ref[...]
    h = jnp.maximum(h, 0.0).astype(jnp.bfloat16)
    h = jnp.dot(h, w2_ref[...], preferred_element_type=jnp.float32) + b2_ref[...]
    h = jnp.maximum(h, 0.0).astype(jnp.bfloat16)
    h = jnp.dot(h, w3_ref[...], preferred_element_type=jnp.float32) + b3_ref[...]
    h = jnp.maximum(h, 0.0).astype(jnp.bfloat16)

    # Output layer: Linear -> Softmax(dim=1).  Padded columns carry a -1e30 bias so
    # exp(logit - m) is exactly 0 there and they drop out of the normalization.
    logits = jnp.dot(h, w4_ref[...], preferred_element_type=jnp.float32) + b4_ref[...]
    m = jnp.max(logits, axis=-1, keepdims=True)
    e = jnp.exp(logits - m)
    denom = jnp.sum(e, axis=-1, keepdims=True)
    o_ref[...] = e / denom          # exact divide: rows sum to 1 to f32 precision


def _choose_tiling(B, tile_b):
    """Pick (tile, B_pad) so that (a) tile <= ~tile_b rows, (b) tile % 16 == 0 (bf16
    sublane packing), (c) ragged padding is < 16 rows per tile, and (d) the grid has
    at least 2 steps when B >= 32 so both v7x TensorCores get work."""
    n_steps = pl.cdiv(B, tile_b)
    if B >= 32:
        n_steps = max(n_steps, 2)
    tile = _round_up(pl.cdiv(B, n_steps), 16)
    return tile, n_steps * tile


def neural_network_forward(x_nchw, prepared_params, *, tile_b=512):
    """x_nchw: (B, 1, 28, 28) float32.  Returns (B, 10) softmax probabilities (f32)."""
    B = x_nchw.shape[0]
    x = x_nchw.reshape(B, -1).astype(jnp.float32)      # nn.Flatten(); stays f32 (kernel casts)

    tile, B_pad = _choose_tiling(B, tile_b)
    if B_pad != B:
        x = jnp.pad(x, ((0, B_pad - B), (0, 0)))

    (w1, b1, w2, b2, w3, b3, w4, b4) = prepared_params

    wspec = lambda shape: pl.BlockSpec(shape, lambda i: (0, 0))   # grid-invariant operand

    grid_spec = pltpu.PrefetchScalarGridSpec(
        num_scalar_prefetch=0,
        grid=(B_pad // tile,),
        in_specs=[
            pl.BlockSpec((tile, D_IN), lambda i: (i, 0)),         # x batch tile (f32)
            wspec((D_IN, D_H)), wspec((1, D_H)),
            wspec((D_H, D_H)),  wspec((1, D_H)),
            wspec((D_H, D_H)),  wspec((1, D_H)),
            wspec((D_H, D_OUT_PAD)), wspec((1, D_OUT_PAD)),
        ],
        out_specs=pl.BlockSpec((tile, D_OUT_PAD), lambda i: (i, 0)),
    )

    out = pl.pallas_call(
        mlp_kernel,
        out_shape=jax.ShapeDtypeStruct((B_pad, D_OUT_PAD), jnp.float32),
        grid_spec=grid_spec,
        compiler_params=pltpu.CompilerParams(
            dimension_semantics=("parallel",),
        ),
    )(x, w1, b1, w2, b2, w3, b3, w4, b4)

    return out[:B, :D_OUT]


# ----------------------------- parameters -----------------------------------

def init_params(key):
    """Raw parameters matching a fresh PyTorch NeuralNetwork (xavier_uniform linear weights,
    default linear bias init, default BatchNorm1d buffers), stored as (in, out)."""
    ks = jax.random.split(key, 8)

    def xavier(k, fan_in, fan_out):
        bound = math.sqrt(6.0 / (fan_in + fan_out))
        return jax.random.uniform(k, (fan_in, fan_out), jnp.float32, -bound, bound)

    def lin_bias(k, fan_in, fan_out):
        bound = 1.0 / math.sqrt(fan_in)
        return jax.random.uniform(k, (1, fan_out), jnp.float32, -bound, bound)

    def bn(num_features):
        # fresh nn.BatchNorm1d: weight=1, bias=0, running_mean=0, running_var=1
        return (jnp.ones((1, num_features), jnp.float32),
                jnp.zeros((1, num_features), jnp.float32),
                jnp.zeros((1, num_features), jnp.float32),
                jnp.ones((1, num_features), jnp.float32))

    return {
        "w1": xavier(ks[0], D_IN, D_H), "b1": lin_bias(ks[1], D_IN, D_H), "bn1": bn(D_H),
        "w2": xavier(ks[2], D_H, D_H),  "b2": lin_bias(ks[3], D_H, D_H),  "bn2": bn(D_H),
        "w3": xavier(ks[4], D_H, D_H),  "b3": lin_bias(ks[5], D_H, D_H),  "bn3": bn(D_H),
        "w4": xavier(ks[6], D_H, D_OUT), "b4": lin_bias(ks[7], D_H, D_OUT),
    }


def prepare_params(p):
    """One-time transform: fold eval-mode BatchNorm into W/b, pad the classifier to 128
    lane-dense columns (-1e30 bias on the padding), cast weights to bf16 (biases stay f32)."""
    def fold(w, b, bn_params):
        gamma, beta, mean, var = bn_params
        scale = gamma / jnp.sqrt(var + BN_EPS)                 # (1, out)
        shift = beta - mean * scale
        return w * scale, b * scale + shift

    w1, b1 = fold(p["w1"], p["b1"], p["bn1"])
    w2, b2 = fold(p["w2"], p["b2"], p["bn2"])
    w3, b3 = fold(p["w3"], p["b3"], p["bn3"])

    w4 = jnp.pad(p["w4"], ((0, 0), (0, D_OUT_PAD - D_OUT)))
    b4 = jnp.pad(p["b4"], ((0, 0), (0, D_OUT_PAD - D_OUT)), constant_values=NEG_INF)

    bf16 = lambda w: w.astype(jnp.bfloat16)
    return (bf16(w1), b1.astype(jnp.float32),
            bf16(w2), b2.astype(jnp.float32),
            bf16(w3), b3.astype(jnp.float32),
            bf16(w4), b4.astype(jnp.float32))


# ----------------------------- reference ------------------------------------

def _reference_forward(x_nchw, p):
    """Pure-JAX f32 reference with the original (unfolded, unpadded) eval-mode semantics."""
    def bn_eval(h, bn_params):
        gamma, beta, mean, var = bn_params
        return (h - mean) / jnp.sqrt(var + BN_EPS) * gamma + beta

    x = x_nchw.reshape(x_nchw.shape[0], -1).astype(jnp.float32)
    h = jnp.maximum(bn_eval(x @ p["w1"] + p["b1"], p["bn1"]), 0.0)
    h = jnp.maximum(bn_eval(h @ p["w2"] + p["b2"], p["bn2"]), 0.0)
    h = jnp.maximum(bn_eval(h @ p["w3"] + p["b3"], p["bn3"]), 0.0)
    return jax.nn.softmax(h @ p["w4"] + p["b4"], axis=1)


if __name__ == "__main__":
    key = jax.random.PRNGKey(0)
    k_x, k_p = jax.random.split(key)

    # Small deterministic test batch (real workloads should use B >= 2*tile_b so the
    # "parallel" grid axis spans both v7x TensorCores with full tiles).
    B = 16
    x = jax.random.normal(k_x, (B, 1, 28, 28), jnp.float32)   # NCHW, MNIST-like

    raw_params = init_params(k_p)
    params = prepare_params(raw_params)

    out = neural_network_forward(x, params)                   # tile auto-clamped to the batch
    out = jax.block_until_ready(out)

    ref = _reference_forward(x, raw_params)
    assert out.shape == (B, D_OUT)
    # bf16 weights/activations vs f32 reference: loose but meaningful tolerance on probabilities.
    assert jnp.allclose(out, ref, atol=2e-2), float(jnp.max(jnp.abs(out - ref)))
    assert jnp.allclose(jnp.sum(out, axis=1), jnp.ones((B,)), atol=1e-3)

    print("KERNEL_OK")
</pallas_src>

<mosaic_0001>
module attributes {stable_mosaic.version = 11 : i64} {
  func.func @mlp_kernel(%arg0: i32, %arg1: memref<16x784xf32, #tpu.memory_space<vmem>>, %arg2: memref<784x512xbf16, #tpu.memory_space<vmem>>, %arg3: memref<1x512xf32, #tpu.memory_space<vmem>>, %arg4: memref<512x512xbf16, #tpu.memory_space<vmem>>, %arg5: memref<1x512xf32, #tpu.memory_space<vmem>>, %arg6: memref<512x512xbf16, #tpu.memory_space<vmem>>, %arg7: memref<1x512xf32, #tpu.memory_space<vmem>>, %arg8: memref<512x128xbf16, #tpu.memory_space<vmem>>, %arg9: memref<1x128xf32, #tpu.memory_space<vmem>>, %arg10: memref<16x128xf32, #tpu.memory_space<vmem>>) attributes {dimension_semantics = [#tpu.dimension_semantics<parallel>], iteration_bounds = array<i64: 1>, scalar_prefetch = 0 : i64, scratch_operands = 0 : i64, tpu.core_type = #tpu.core_type<tc>, window_params = [{transform_indices = @transform_0, window_bounds = array<i64: 16, 784>}, {pipeline_mode = #tpu.pipeline_mode<synchronous>, transform_indices = @transform_1, window_bounds = array<i64: 784, 512>}, {pipeline_mode = #tpu.pipeline_mode<synchronous>, transform_indices = @transform_2, window_bounds = array<i64: 1, 512>}, {pipeline_mode = #tpu.pipeline_mode<synchronous>, transform_indices = @transform_3, window_bounds = array<i64: 512, 512>}, {pipeline_mode = #tpu.pipeline_mode<synchronous>, transform_indices = @transform_4, window_bounds = array<i64: 1, 512>}, {pipeline_mode = #tpu.pipeline_mode<synchronous>, transform_indices = @transform_5, window_bounds = array<i64: 512, 512>}, {pipeline_mode = #tpu.pipeline_mode<synchronous>, transform_indices = @transform_6, window_bounds = array<i64: 1, 512>}, {pipeline_mode = #tpu.pipeline_mode<synchronous>, transform_indices = @transform_7, window_bounds = array<i64: 512, 128>}, {pipeline_mode = #tpu.pipeline_mode<synchronous>, transform_indices = @transform_8, window_bounds = array<i64: 1, 128>}, {transform_indices = @transform_9, window_bounds = array<i64: 16, 128>}]} {
    %c0 = arith.constant 0 : index
    %c0_0 = arith.constant 0 : index
    %0 = vector.load %arg1[%c0, %c0_0] : memref<16x784xf32, #tpu.memory_space<vmem>>, vector<16x784xf32>
    %1 = arith.truncf %0 : vector<16x784xf32> to vector<16x784xbf16>
    %c0_1 = arith.constant 0 : index
    %c0_2 = arith.constant 0 : index
    %2 = vector.load %arg2[%c0_1, %c0_2] : memref<784x512xbf16, #tpu.memory_space<vmem>>, vector<784x512xbf16>
    %cst = arith.constant dense<0.000000e+00> : vector<16x512xf32>
    %3 = tpu.matmul %1, %2, %cst {dimension_numbers = #tpu.dot_dimension_numbers<[1], [0], [0], [1], [0, 0, 1, 1], [], []>} : vector<16x784xbf16>, vector<784x512xbf16>, vector<16x512xf32> -> vector<16x512xf32>
    %c0_3 = arith.constant 0 : index
    %c0_4 = arith.constant 0 : index
    %4 = vector.load %arg3[%c0_3, %c0_4] : memref<1x512xf32, #tpu.memory_space<vmem>>, vector<1x512xf32>
    %5 = vector.broadcast %4 : vector<1x512xf32> to vector<16x512xf32>
    %6 = arith.addf %3, %5 : vector<16x512xf32>
    %cst_5 = arith.constant 0.000000e+00 : f32
    %7 = vector.broadcast %cst_5 : f32 to vector<16x512xf32>
    %8 = arith.maximumf %6, %7 : vector<16x512xf32>
    %9 = arith.truncf %8 : vector<16x512xf32> to vector<16x512xbf16>
    %c0_6 = arith.constant 0 : index
    %c0_7 = arith.constant 0 : index
    %10 = vector.load %arg4[%c0_6, %c0_7] : memref<512x512xbf16, #tpu.memory_space<vmem>>, vector<512x512xbf16>
    %cst_8 = arith.constant dense<0.000000e+00> : vector<16x512xf32>
    %11 = tpu.matmul %9, %10, %cst_8 {dimension_numbers = #tpu.dot_dimension_numbers<[1], [0], [0], [1], [0, 0, 1, 1], [], []>} : vector<16x512xbf16>, vector<512x512xbf16>, vector<16x512xf32> -> vector<16x512xf32>
    %c0_9 = arith.constant 0 : index
    %c0_10 = arith.constant 0 : index
    %12 = vector.load %arg5[%c0_9, %c0_10] : memref<1x512xf32, #tpu.memory_space<vmem>>, vector<1x512xf32>
    %13 = vector.broadcast %12 : vector<1x512xf32> to vector<16x512xf32>
    %14 = arith.addf %11, %13 : vector<16x512xf32>
    %cst_11 = arith.constant 0.000000e+00 : f32
    %15 = vector.broadcast %cst_11 : f32 to vector<16x512xf32>
    %16 = arith.maximumf %14, %15 : vector<16x512xf32>
    %17 = arith.truncf %16 : vector<16x512xf32> to vector<16x512xbf16>
    %c0_12 = arith.constant 0 : index
    %c0_13 = arith.constant 0 : index
    %18 = vector.load %arg6[%c0_12, %c0_13] : memref<512x512xbf16, #tpu.memory_space<vmem>>, vector<512x512xbf16>
    %cst_14 = arith.constant dense<0.000000e+00> : vector<16x512xf32>
    %19 = tpu.matmul %17, %18, %cst_14 {dimension_numbers = #tpu.dot_dimension_numbers<[1], [0], [0], [1], [0, 0, 1, 1], [], []>} : vector<16x512xbf16>, vector<512x512xbf16>, vector<16x512xf32> -> vector<16x512xf32>
    %c0_15 = arith.constant 0 : index
    %c0_16 = arith.constant 0 : index
    %20 = vector.load %arg7[%c0_15, %c0_16] : memref<1x512xf32, #tpu.memory_space<vmem>>, vector<1x512xf32>
    %21 = vector.broadcast %20 : vector<1x512xf32> to vector<16x512xf32>
    %22 = arith.addf %19, %21 : vector<16x512xf32>
    %cst_17 = arith.constant 0.000000e+00 : f32
    %23 = vector.broadcast %cst_17 : f32 to vector<16x512xf32>
    %24 = arith.maximumf %22, %23 : vector<16x512xf32>
    %25 = arith.truncf %24 : vector<16x512xf32> to vector<16x512xbf16>
    %c0_18 = arith.constant 0 : index
    %c0_19 = arith.constant 0 : index
    %26 = vector.load %arg8[%c0_18, %c0_19] : memref<512x128xbf16, #tpu.memory_space<vmem>>, vector<512x128xbf16>
    %cst_20 = arith.constant dense<0.000000e+00> : vector<16x128xf32>
    %27 = tpu.matmul %25, %26, %cst_20 {dimension_numbers = #tpu.dot_dimension_numbers<[1], [0], [0], [1], [0, 0, 1, 1], [], []>} : vector<16x512xbf16>, vector<512x128xbf16>, vector<16x128xf32> -> vector<16x128xf32>
    %c0_21 = arith.constant 0 : index
    %c0_22 = arith.constant 0 : index
    %28 = vector.load %arg9[%c0_21, %c0_22] : memref<1x128xf32, #tpu.memory_space<vmem>>, vector<1x128xf32>
    %29 = vector.broadcast %28 : vector<1x128xf32> to vector<16x128xf32>
    %30 = arith.addf %27, %29 : vector<16x128xf32>
    %cst_23 = arith.constant dense<0xFF800000> : vector<16xf32>
    %31 = vector.multi_reduction <maximumf>, %30, %cst_23 [1] : vector<16x128xf32> to vector<16xf32>
    %32 = vector.shape_cast %31 : vector<16xf32> to vector<16x1xf32>
    %33 = vector.broadcast %32 : vector<16x1xf32> to vector<16x128xf32>
    %34 = arith.subf %30, %33 : vector<16x128xf32>
    %35 = math.exp %34 : vector<16x128xf32>
    %cst_24 = arith.constant dense<0.000000e+00> : vector<16xf32>
    %36 = vector.multi_reduction <add>, %35, %cst_24 [1] : vector<16x128xf32> to vector<16xf32>
    %37 = vector.shape_cast %36 : vector<16xf32> to vector<16x1xf32>
    %38 = vector.broadcast %37 : vector<16x1xf32> to vector<16x128xf32>
    %39 = arith.divf %35, %38 : vector<16x128xf32>
    %c0_25 = arith.constant 0 : index
    %c0_26 = arith.constant 0 : index
    %40 = vector.load %arg10[%c0_25, %c0_26] : memref<16x128xf32, #tpu.memory_space<vmem>>, vector<16x128xf32>
    tpu.vector_store %arg10[%c0_25, %c0_26], %39 {strides = array<i32>} : memref<16x128xf32, #tpu.memory_space<vmem>>, vector<16x128xf32>,
    return
  }
  func.func @transform_0(%arg0: i32) -> (i32, i32) {
    %c0_i32 = arith.constant 0 : i32
    %c0_i32_0 = arith.constant 0 : i32
    return %arg0, %c0_i32 : i32, i32
  }
  func.func @transform_1(%arg0: i32) -> (i32, i32) {
    %c0_i32 = arith.constant 0 : i32
    %c0_i32_0 = arith.constant 0 : i32
    %c0_i32_1 = arith.constant 0 : i32
    return %c0_i32, %c0_i32_0 : i32, i32
  }
  func.func @transform_2(%arg0: i32) -> (i32, i32) {
    %c0_i32 = arith.constant 0 : i32
    %c0_i32_0 = arith.constant 0 : i32
    %c0_i32_1 = arith.constant 0 : i32
    return %c0_i32, %c0_i32_0 : i32, i32
  }
  func.func @transform_3(%arg0: i32) -> (i32, i32) {
    %c0_i32 = arith.constant 0 : i32
    %c0_i32_0 = arith.constant 0 : i32
    %c0_i32_1 = arith.constant 0 : i32
    return %c0_i32, %c0_i32_0 : i32, i32
  }
  func.func @transform_4(%arg0: i32) -> (i32, i32) {
    %c0_i32 = arith.constant 0 : i32
    %c0_i32_0 = arith.constant 0 : i32
    %c0_i32_1 = arith.constant 0 : i32
    return %c0_i32, %c0_i32_0 : i32, i32
  }
  func.func @transform_5(%arg0: i32) -> (i32, i32) {
    %c0_i32 = arith.constant 0 : i32
    %c0_i32_0 = arith.constant 0 : i32
    %c0_i32_1 = arith.constant 0 : i32
    return %c0_i32, %c0_i32_0 : i32, i32
  }
  func.func @transform_6(%arg0: i32) -> (i32, i32) {
    %c0_i32 = arith.constant 0 : i32
    %c0_i32_0 = arith.constant 0 : i32
    %c0_i32_1 = arith.constant 0 : i32
    return %c0_i32, %c0_i32_0 : i32, i32
  }
  func.func @transform_7(%arg0: i32) -> (i32, i32) {
    %c0_i32 = arith.constant 0 : i32
    %c0_i32_0 = arith.constant 0 : i32
    %c0_i32_1 = arith.constant 0 : i32
    return %c0_i32, %c0_i32_0 : i32, i32
  }
  func.func @transform_8(%arg0: i32) -> (i32, i32) {
    %c0_i32 = arith.constant 0 : i32
    %c0_i32_0 = arith.constant 0 : i32
    %c0_i32_1 = arith.constant 0 : i32
    return %c0_i32, %c0_i32_0 : i32, i32
  }
  func.func @transform_9(%arg0: i32) -> (i32, i32) {
    %c0_i32 = arith.constant 0 : i32
    %c0_i32_0 = arith.constant 0 : i32
    return %arg0, %c0_i32 : i32, i32
  }
}

</mosaic_0001>

<bundles_post_ra>
// kernel: tpu_custom_call.1
= control target key start
LH: loop header
LB: loop body
LE: loop exit
PB: predicated region body
PF: predicated region fallthrough
CT: control target
= control target key end

     0   :  { %14 = vsyncpa [#allocation3], 0  ;;  %s5667_s0 = inlined_call_operand.hbm [shape: f32[16,784], index: 0, kind: input, shape index: {}]   ;;  %s5668_s1 = inlined_call_operand.hbm [shape: bf16[784,512], index: 1, kind: input, shape index: {}]   ;;  %s5669_s2 = inlined_call_operand.vmem [shape: f32[1,512], index: 2, kind: input, shape index: {}]   ;;  %s5670_s3 = inlined_call_operand.hbm [shape: bf16[512,512], index: 3, kind: input, shape index: {}]   ;;  %s5671_s4 = inlined_call_operand.vmem [shape: f32[1,512], index: 4, kind: input, shape index: {}]   ;;  %s5672_s5 = inlined_call_operand.hbm [shape: bf16[512,512], index: 5, kind: input, shape index: {}]   ;;  %s5673_s6 = inlined_call_operand.vmem [shape: f32[1,512], index: 6, kind: input, shape index: {}]   ;;  %s5674_s7 = inlined_call_operand.hbm [shape: bf16[512,128], index: 7, kind: input, shape index: {}]   ;;  %s5675_s8 = inlined_call_operand.vmem [shape: f32[1,128], index: 8, kind: input, shape index: {}]   ;;  %s5676_s9 = inlined_call_operand.hbm [shape: f32[16,128], index: 9, kind: output, shape index: {}]  }
   0x1   :  { %15 = vsyncpa [#allocation6], 0 }
   0x2   :  { %16 = vsyncpa [#allocation9], 0 }
   0x3   :  { %17 = vsyncpa [#allocation4], 0  ;;  %s5481_s30 = smov [#allocation5]   ;;  %s5341_s13 = scalar_lea.hbm %s5668_s1, 25088 }
   0x4   :  { %s35_s10 = sshll.u32 %s5481_s30, 4  ;;  %p5342_p0 = scmp.ne.s32.totalorder %s5668_s1, %s5341_s13  ;;  %s36_s10 = int_to_ptr.vmem [resolvable:$true] %s35_s10 }
   0x5   :  { %p5345_p1 = scmp.lt.u32.totalorder %s5341_s13, %s5668_s1 }
   0x7   :  { %p5347_p2 = pnand %p5345_p1, %p5342_p0 }
   0x9   :  { %5350 = shalt.err (!%p5347_p2)
}
   0xa   :  { %s5351_s18 = scalar_lea.vmem %s36_s10, 25088  ;;  %p5356_p4 = scmp.lt.s32.totalorder %s36_s10, %s36_s10 }
   0xb   :  { %p5352_p3 = scmp.ne.s32.totalorder %s36_s10, %s5351_s18  ;;  %p5357_p5 = scmp.lt.s32.totalorder %s5351_s18, %s5351_s18 }
   0xd   :  { %p5358_p6 = por %p5357_p5, %p5356_p4 }
   0xf   :  { %p5359_p7 = pnand %p5358_p6, %p5352_p3 }
  0x11   :  { %5362 = shalt.err (!%p5359_p7)
}
  0x12   :  { %s5482_s19 = smov 256   ;;  %s5483_s20 = smov 16  }
  0x13   :  { %41 = dma.hbm_to_vmem [thread:$0]  %s5668_s1, 25088, %s36_s10, [#allocation6], %s5482_s19, %s5482_s19, %s5483_s20  }
  0x14   :  { %s5484_s23 = smov [#allocation8]   ;;  %s5485_s25 = smov [#allocation2]  }
  0x15   :  { %s63_s24 = sshll.u32 %s5484_s23, 4  ;;  %s23_s26 = sshll.u32 %s5485_s25, 4  ;;  %s64_s24 = int_to_ptr.vmem [resolvable:$true] %s63_s24  ;;  %s24_s26 = int_to_ptr.vmem [resolvable:$true] %s23_s26 }
  0x16   :  { %s5363_s29 = scalar_lea.hbm %s5672_s5, 16384 }
  0x17   :  { %p5364_p8 = scmp.ne.s32.totalorder %s5672_s5, %s5363_s29  ;;  %p5367_p9 = scmp.lt.u32.totalorder %s5363_s29, %s5672_s5 }
  0x19   :  { %p5369_p10 = pnand %p5367_p9, %p5364_p8 }
  0x1b   :  { %5372 = shalt.err (!%p5369_p10)
}
  0x1c   :  { %s5373_s1 = scalar_lea.vmem %s64_s24, 16384  ;;  %p5378_p12 = scmp.lt.s32.totalorder %s64_s24, %s64_s24 }
  0x1d   :  { %p5374_p11 = scmp.ne.s32.totalorder %s64_s24, %s5373_s1  ;;  %p5379_p13 = scmp.lt.s32.totalorder %s5373_s1, %s5373_s1 }
  0x1f   :  { %p5380_p0 = por %p5379_p13, %p5378_p12 }
  0x21   :  { %p5381_p1 = pnand %p5380_p0, %p5374_p11 }
  0x23   :  { %5384 = shalt.err (!%p5381_p1)
}
  0x24   :  { %69 = dma.hbm_to_vmem [thread:$0]  %s5672_s5, 16384, %s64_s24, [#allocation9], %s5482_s19, %s5482_s19, %s5483_s20  }
  0x25   :  { %s5385_s17 = scalar_lea.hbm %s5667_s0, 1792 }
  0x26   :  { %p5386_p2 = scmp.ne.s32.totalorder %s5667_s0, %s5385_s17  ;;  %p5389_p3 = scmp.lt.u32.totalorder %s5385_s17, %s5667_s0 }
  0x28   :  { %p5391_p4 = pnand %p5389_p3, %p5386_p2 }
  0x2a   :  { %5394 = shalt.err (!%p5391_p4)
}
  0x2b   :  { %s5395_s25 = scalar_lea.vmem %s24_s26, 1792  ;;  %p5400_p6 = scmp.lt.s32.totalorder %s24_s26, %s24_s26 }
  0x2c   :  { %p5396_p5 = scmp.ne.s32.totalorder %s24_s26, %s5395_s25  ;;  %p5401_p7 = scmp.lt.s32.totalorder %s5395_s25, %s5395_s25 }
  0x2e   :  { %p5402_p8 = por %p5401_p7, %p5400_p6 }
  0x30   :  { %p5403_p9 = pnand %p5402_p8, %p5396_p5 }
  0x32   :  { %5406 = shalt.err (!%p5403_p9)
}
  0x33   :  { %s5486_s5 = smov 896   ;;  %s5487_s24 = smov 56  }
  0x34   :  { %29 = dma.hbm_to_vmem [thread:$0]  %s5667_s0, 1792, %s24_s26, [#allocation3], %s5486_s5, %s5486_s5, %s5487_s24  }
  0x35   :  { %s5488_s29 = smov [#allocation7]   ;;  %s5489_s11 = smov [#allocation10]  }
  0x36   :  { %s49_s30 = sshll.u32 %s5488_s29, 4  ;;  %s77_s12 = sshll.u32 %s5489_s11, 4  ;;  %s50_s30 = int_to_ptr.vmem [resolvable:$true] %s49_s30  ;;  %s78_s12 = int_to_ptr.vmem [resolvable:$true] %s77_s12 }
  0x37   :  { %s5407_s10 = scalar_lea.hbm %s5670_s3, 16384 }
  0x38   :  { %p5408_p10 = scmp.ne.s32.totalorder %s5670_s3, %s5407_s10  ;;  %p5411_p11 = scmp.lt.u32.totalorder %s5407_s10, %s5670_s3 }
  0x3a   :  { %p5413_p12 = pnand %p5411_p11, %p5408_p10 }
  0x3c   :  { %5416 = shalt.err (!%p5413_p12)
}
  0x3d   :  { %s5417_s0 = scalar_lea.vmem %s50_s30, 16384  ;;  %p5422_p0 = scmp.lt.s32.totalorder %s50_s30, %s50_s30 }
  0x3e   :  { %p5418_p13 = scmp.ne.s32.totalorder %s50_s30, %s5417_s0  ;;  %p5423_p1 = scmp.lt.s32.totalorder %s5417_s0, %s5417_s0 }
  0x40   :  { %p5424_p2 = por %p5423_p1, %p5422_p0 }
  0x42   :  { %p5425_p3 = pnand %p5424_p2, %p5418_p13 }
  0x44   :  { %5428 = shalt.err (!%p5425_p3)
}
  0x45   :  { %55 = dma.hbm_to_vmem [thread:$0]  %s5670_s3, 16384, %s50_s30, [#allocation6], %s5482_s19, %s5482_s19, %s5483_s20  }
  0x46   :  { %s5429_s23 = scalar_lea.hbm %s5674_s7, 4096 }
  0x47   :  { %p5430_p4 = scmp.ne.s32.totalorder %s5674_s7, %s5429_s23  ;;  %p5433_p5 = scmp.lt.u32.totalorder %s5429_s23, %s5674_s7 }
  0x49   :  { %p5435_p6 = pnand %p5433_p5, %p5430_p4 }
  0x4b   :  { %5438 = shalt.err (!%p5435_p6)
}
  0x4c   :  { %s5439_s28 = scalar_lea.vmem %s78_s12, 4096  ;;  %p5444_p8 = scmp.lt.s32.totalorder %s78_s12, %s78_s12 }
  0x4d   :  { %p5440_p7 = scmp.ne.s32.totalorder %s78_s12, %s5439_s28  ;;  %p5445_p9 = scmp.lt.s32.totalorder %s5439_s28, %s5439_s28 }
  0x4f   :  { %p5446_p10 = por %p5445_p9, %p5444_p8 }
  0x51   :  { %p5447_p11 = pnand %p5446_p10, %p5440_p7 }
  0x53   :  { %5450 = shalt.err (!%p5447_p11)
}
  0x54   :  { %s5490_s3 = smov 64   ;;  %s5491_s19 = smov 4  }
  0x55   :  { %83 = dma.hbm_to_vmem [thread:$0]  %s5674_s7, 4096, %s78_s12, [#allocation9], %s5490_s3, %s5490_s3, %s5491_s19  }
  0x56   :  { %5473 = dma.done.wait [#allocation3], 1792  }
  0x57   :  { %5474 = vsyncadd [#allocation3], 4294965504 }
  0x58   :  { %5475 = dma.done.wait [#allocation6], 41472  }
  0x59   :  { %5476 = vsyncadd [#allocation6], 4294925824 }
  0x5a   :  { %5477 = dma.done.wait [#allocation9], 20480  }
  0x5b   :  { %5478 = vsyncadd [#allocation9], 4294946816  ;;  %v4623_v0 = vld [vmem:[#allocation5 + $0x4] ss:$16 sps:$4 sm:$0xff]   ;;  %v4625_v1 = vld [vmem:[#allocation5 + $0xc] ss:$16 sps:$4 sm:$0xff]  }
  0x5c   :  { %1325 = vmatprep.subr.bf16.mxu0 %v4623_v0  ;;  %v4627_v2 = vld [vmem:[#allocation5] ss:$16 sps:$4 sm:$0xff]   ;;  %v4628_v3 = vld [vmem:[#allocation5 + $0x8] ss:$16 sps:$4 sm:$0xff]   ;;  %1497 = vmatprep.subr.bf16.mxu1 %v4625_v1  ;;  %v4629_v4 = vld [vmem:[#allocation5 + $0x24] ss:$16 sps:$4 sm:$0xff]  }
  0x5d   :  { %1326 = vmatpush1.bf16.msra.mxu0 %v4627_v2  ;;  %1498 = vmatpush1.bf16.msra.mxu1 %v4628_v3  ;;  %v4631_v5 = vld [vmem:[#allocation5 + $0x2c] ss:$16 sps:$4 sm:$0xff]   ;;  %v4633_v6 = vld [vmem:[#allocation5 + $0x20] ss:$16 sps:$4 sm:$0xff]   ;;  %v4634_v7 = vld [vmem:[#allocation5 + $0x28] ss:$16 sps:$4 sm:$0xff]  }
  0x5e   :  { %1327 = vmatprep.subr.bf16.mxu0 %v4629_v4  ;;  %1499 = vmatprep.subr.bf16.mxu1 %v4631_v5  ;;  %v4635_v8 = vld [vmem:[#allocation5 + $0x44] ss:$16 sps:$4 sm:$0xff]   ;;  %v4637_v9 = vld [vmem:[#allocation5 + $0x4c] ss:$16 sps:$4 sm:$0xff]   ;;  %v4639_v10 = vld [vmem:[#allocation5 + $0x40] ss:$16 sps:$4 sm:$0xff]  }
  0x5f   :  { %v4640_v11 = vld [vmem:[#allocation5 + $0x48] ss:$16 sps:$4 sm:$0xff]   ;;  %v4641_v12 = vld [vmem:[#allocation5 + $0x64] ss:$16 sps:$4 sm:$0xff]   ;;  %v4643_v13 = vld [vmem:[#allocation5 + $0x6c] ss:$16 sps:$4 sm:$0xff]  }
  0x60   :  { %v4645_v14 = vld [vmem:[#allocation5 + $0x60] ss:$16 sps:$4 sm:$0xff]   ;;  %v4646_v15 = vld [vmem:[#allocation5 + $0x68] ss:$16 sps:$4 sm:$0xff]   ;;  %v4647_v16 = vld [vmem:[#allocation5 + $0x84] ss:$16 sps:$4 sm:$0xff]  }
  0x61   :  { %1328 = vmatpush1.bf16.msra.mxu0 %v4633_v6  ;;  %1500 = vmatpush1.bf16.msra.mxu1 %v4634_v7  ;;  %v4649_v17 = vld [vmem:[#allocation5 + $0x8c] ss:$16 sps:$4 sm:$0xff]   ;;  %v4651_v18 = vld [vmem:[#allocation5 + $0x80] ss:$16 sps:$4 sm:$0xff]   ;;  %v4652_v19 = vld [vmem:[#allocation5 + $0x88] ss:$16 sps:$4 sm:$0xff]  }
  0x62   :  { %1329 = vmatprep.subr.bf16.mxu0 %v4635_v8  ;;  %1501 = vmatprep.subr.bf16.mxu1 %v4637_v9  ;;  %v4653_v20 = vld [vmem:[#allocation5 + $0xa4] ss:$16 sps:$4 sm:$0xff]   ;;  %v4655_v21 = vld [vmem:[#allocation5 + $0xac] ss:$16 sps:$4 sm:$0xff]   ;;  %v4657_v22 = vld [vmem:[#allocation5 + $0xa0] ss:$16 sps:$4 sm:$0xff]  }
  0x63   :  { %v4658_v23 = vld [vmem:[#allocation5 + $0xa8] ss:$16 sps:$4 sm:$0xff]   ;;  %v4659_v24 = vld [vmem:[#allocation5 + $0xc4] ss:$16 sps:$4 sm:$0xff]   ;;  %v4661_v25 = vld [vmem:[#allocation5 + $0xcc] ss:$16 sps:$4 sm:$0xff]  }
  0x64   :  { %v4663_v26 = vld [vmem:[#allocation5 + $0xc0] ss:$16 sps:$4 sm:$0xff]   ;;  %v4664_v27 = vld [vmem:[#allocation5 + $0xc8] ss:$16 sps:$4 sm:$0xff]   ;;  %v4665_v28 = vld [vmem:[#allocation5 + $0xe4] ss:$16 sps:$4 sm:$0xff]  }
  0x65   :  { %1330 = vmatpush1.bf16.msra.mxu0 %v4639_v10  ;;  %1502 = vmatpush1.bf16.msra.mxu1 %v4640_v11  ;;  %v4667_v29 = vld [vmem:[#allocation5 + $0xec] ss:$16 sps:$4 sm:$0xff]   ;;  %v4669_v30 = vld [vmem:[#allocation5 + $0xe0] ss:$16 sps:$4 sm:$0xff]   ;;  %v4670_v31 = vld [vmem:[#allocation5 + $0xe8] ss:$16 sps:$4 sm:$0xff]  }
  0x66   :  { %1331 = vmatprep.subr.bf16.mxu0 %v4641_v12  ;;  %1503 = vmatprep.subr.bf16.mxu1 %v4643_v13  ;;  %v4671_v32 = vld [vmem:[#allocation5 + $0x104] ss:$16 sps:$4 sm:$0xff]   ;;  %v4673_v33 = vld [vmem:[#allocation5 + $0x10c] ss:$16 sps:$4 sm:$0xff]   ;;  %v4675_v34 = vld [vmem:[#allocation5 + $0x100] ss:$16 sps:$4 sm:$0xff]  }
  0x67   :  { %v4676_v35 = vld [vmem:[#allocation5 + $0x108] ss:$16 sps:$4 sm:$0xff]   ;;  %v4677_v36 = vld [vmem:[#allocation5 + $0x124] ss:$16 sps:$4 sm:$0xff]   ;;  %v4679_v37 = vld [vmem:[#allocation5 + $0x12c] ss:$16 sps:$4 sm:$0xff]  }
  0x68   :  { %v4681_v38 = vld [vmem:[#allocation5 + $0x120] ss:$16 sps:$4 sm:$0xff]   ;;  %v4682_v39 = vld [vmem:[#allocation5 + $0x128] ss:$16 sps:$4 sm:$0xff]   ;;  %v4683_v40 = vld [vmem:[#allocation5 + $0x144] ss:$16 sps:$4 sm:$0xff]  }
  0x69   :  { %1332 = vmatpush1.bf16.msra.mxu0 %v4645_v14  ;;  %1504 = vmatpush1.bf16.msra.mxu1 %v4646_v15  ;;  %v4685_v41 = vld [vmem:[#allocation5 + $0x14c] ss:$16 sps:$4 sm:$0xff]   ;;  %v4687_v42 = vld [vmem:[#allocation5 + $0x140] ss:$16 sps:$4 sm:$0xff]   ;;  %v4688_v43 = vld [vmem:[#allocation5 + $0x148] ss:$16 sps:$4 sm:$0xff]  }
  0x6a   :  { %1333 = vmatprep.subr.bf16.mxu0 %v4647_v16  ;;  %1505 = vmatprep.subr.bf16.mxu1 %v4649_v17  ;;  %v4689_v44 = vld [vmem:[#allocation5 + $0x164] ss:$16 sps:$4 sm:$0xff]   ;;  %v4691_v45 = vld [vmem:[#allocation5 + $0x16c] ss:$16 sps:$4 sm:$0xff]   ;;  %v4693_v48 = vld [vmem:[#allocation5 + $0x160] ss:$16 sps:$4 sm:$0xff]  }
  0x6b   :  { %v103_v46 = vld [vmem:[#allocation2 + $0x8] sm:$0xff]  ;;  %v110_v47 = vld [vmem:[#allocation2 + $0x40] sm:$0xff]  ;;  %v109_v5 = vld [vmem:[#allocation2 + $0x38] sm:$0xff]  ;;  %vm1321_vm0 = vcmask 130048  }
  0x6c   :  { %v4694_v49 = vld [vmem:[#allocation5 + $0x168] ss:$16 sps:$4 sm:$0xff]   ;;  %v117_v50 = vpack.c.bf16 %v110_v47, %v103_v46  ;;  %v4695_v51 = vld [vmem:[#allocation5 + $0x184] ss:$16 sps:$4 sm:$0xff]   ;;  %v4697_v52 = vld [vmem:[#allocation5 + $0x18c] ss:$16 sps:$4 sm:$0xff]  }
  0x6d   :  { %1334 = vmatpush1.bf16.msra.mxu0 %v4651_v18  ;;  %1506 = vmatpush1.bf16.msra.mxu1 %v4652_v19  ;;  %v4699_v53 = vld [vmem:[#allocation5 + $0x180] ss:$16 sps:$4 sm:$0xff]   ;;  %v4700_v54 = vld [vmem:[#allocation5 + $0x188] ss:$16 sps:$4 sm:$0xff]   ;;  %v4701_v55 = vld [vmem:[#allocation5 + $0x1a4] ss:$16 sps:$4 sm:$0xff]  }
  0x6e   :  { %1335 = vmatprep.subr.bf16.mxu0 %v4653_v20  ;;  %1507 = vmatprep.subr.bf16.mxu1 %v4655_v21  ;;  %v4703_v56 = vld [vmem:[#allocation5 + $0x1ac] ss:$16 sps:$4 sm:$0xff]   ;;  %v4705_v57 = vld [vmem:[#allocation5 + $0x1a0] ss:$16 sps:$4 sm:$0xff]   ;;  %v4706_v58 = vld [vmem:[#allocation5 + $0x1a8] ss:$16 sps:$4 sm:$0xff]  }
  0x6f   :  { %1357 = vmatprep.mubr.bf16.mxu0 %v117_v50  ;;  %1529 = vmatprep.mubr.bf16.mxu1 %v117_v50  ;;  %v4707_v59 = vld [vmem:[#allocation5 + $0x1c4] ss:$16 sps:$4 sm:$0xff]   ;;  %v4709_v60 = vld [vmem:[#allocation5 + $0x1cc] ss:$16 sps:$4 sm:$0xff]   ;;  %v4711_v61 = vld [vmem:[#allocation5 + $0x1c0] ss:$16 sps:$4 sm:$0xff]  }
  0x70   :  { %v4712_v62 = vld [vmem:[#allocation5 + $0x1c8] ss:$16 sps:$4 sm:$0xff]   ;;  %v4713_v63 = vld [vmem:[#allocation5 + $0x1e4] ss:$16 sps:$4 sm:$0xff]   ;;  %v4715_v0 = vld [vmem:[#allocation5 + $0x1ec] ss:$16 sps:$4 sm:$0xff]  }
  0x71   :  { %1336 = vmatpush1.bf16.msra.mxu0 %v4657_v22  ;;  %1508 = vmatpush1.bf16.msra.mxu1 %v4658_v23  ;;  %v4717_v1 = vld [vmem:[#allocation5 + $0x1e0] ss:$16 sps:$4 sm:$0xff]   ;;  %v4718_v2 = vld [vmem:[#allocation5 + $0x1e8] ss:$16 sps:$4 sm:$0xff]   ;;  %v4721_v3 = vld [vmem:[#allocation5 + $0x204] ss:$16 sps:$4 sm:$0xff]  }
  0x72   :  { %1337 = vmatprep.subr.bf16.mxu0 %v4659_v24  ;;  %1509 = vmatprep.subr.bf16.mxu1 %v4661_v25  ;;  %v102_v4 = vld [vmem:[#allocation2] sm:$0xff]  ;;  %v4724_v6 = vld [vmem:[#allocation5 + $0x20c] ss:$16 sps:$4 sm:$0xff]   ;;  %v4722_v8 = vld [vmem:[#allocation5 + $0x208] ss:$16 sps:$4 sm:$0xff]  }
  0x73   :  { %v4719_v7 = vld [vmem:[#allocation5 + $0x200] ss:$16 sps:$4 sm:$0xff]   ;;  %v116_v9 = vpack.c.bf16 %v109_v5, %v102_v4  ;;  %v4727_v10 = vld [vmem:[#allocation5 + $0x224] ss:$16 sps:$4 sm:$0xff]   ;;  %v4730_v11 = vld [vmem:[#allocation5 + $0x22c] ss:$16 sps:$4 sm:$0xff]  }
  0x74   :  { %v4725_v12 = vld [vmem:[#allocation5 + $0x220] ss:$16 sps:$4 sm:$0xff]   ;;  %v4728_v13 = vld [vmem:[#allocation5 + $0x228] ss:$16 sps:$4 sm:$0xff]   ;;  %v4733_v14 = vld [vmem:[#allocation5 + $0x244] ss:$16 sps:$4 sm:$0xff]  }
  0x75   :  { %1338 = vmatpush1.bf16.msra.mxu0 %v4663_v26  ;;  %1510 = vmatpush1.bf16.msra.mxu1 %v4664_v27  ;;  %v4736_v15 = vld [vmem:[#allocation5 + $0x24c] ss:$16 sps:$4 sm:$0xff]   ;;  %v4731_v16 = vld [vmem:[#allocation5 + $0x240] ss:$16 sps:$4 sm:$0xff]   ;;  %v4734_v17 = vld [vmem:[#allocation5 + $0x248] ss:$16 sps:$4 sm:$0xff]  }
  0x76   :  { %1339 = vmatprep.subr.bf16.mxu0 %v4665_v28  ;;  %1511 = vmatprep.subr.bf16.mxu1 %v4667_v29  ;;  %v4739_v18 = vld [vmem:[#allocation5 + $0x264] ss:$16 sps:$4 sm:$0xff]   ;;  %v4742_v19 = vld [vmem:[#allocation5 + $0x26c] ss:$16 sps:$4 sm:$0xff]   ;;  %v4737_v20 = vld [vmem:[#allocation5 + $0x260] ss:$16 sps:$4 sm:$0xff]  }
  0x77   :  { %v4740_v21 = vld [vmem:[#allocation5 + $0x268] ss:$16 sps:$4 sm:$0xff]   ;;  %v4745_v22 = vld [vmem:[#allocation5 + $0x284] ss:$16 sps:$4 sm:$0xff]   ;;  %v4748_v23 = vld [vmem:[#allocation5 + $0x28c] ss:$16 sps:$4 sm:$0xff]  }
  0x78   :  { %v4743_v24 = vld [vmem:[#allocation5 + $0x280] ss:$16 sps:$4 sm:$0xff]   ;;  %v4746_v25 = vld [vmem:[#allocation5 + $0x288] ss:$16 sps:$4 sm:$0xff]   ;;  %v4751_v26 = vld [vmem:[#allocation5 + $0x2a4] ss:$16 sps:$4 sm:$0xff]  }
  0x79   :  { %1340 = vmatpush1.bf16.msra.mxu0 %v4669_v30  ;;  %1512 = vmatpush1.bf16.msra.mxu1 %v4670_v31  ;;  %v4754_v27 = vld [vmem:[#allocation5 + $0x2ac] ss:$16 sps:$4 sm:$0xff]   ;;  %v4749_v28 = vld [vmem:[#allocation5 + $0x2a0] ss:$16 sps:$4 sm:$0xff]   ;;  %v4752_v29 = vld [vmem:[#allocation5 + $0x2a8] ss:$16 sps:$4 sm:$0xff]  }
  0x7a   :  { %1341 = vmatprep.subr.bf16.mxu0 %v4671_v32  ;;  %1513 = vmatprep.subr.bf16.mxu1 %v4673_v33  ;;  %v4757_v30 = vld [vmem:[#allocation5 + $0x2c4] ss:$16 sps:$4 sm:$0xff]   ;;  %v4760_v31 = vld [vmem:[#allocation5 + $0x2cc] ss:$16 sps:$4 sm:$0xff]   ;;  %v4773_v47 = vld [vmem:[#allocation5 + $0x320] ss:$16 sps:$4 sm:$0xff]  }
  0x7b   :  { %v105_v32 = vld [vmem:[#allocation2 + $0x18] sm:$0xff]  ;;  %v112_v33 = vld [vmem:[#allocation2 + $0x50] sm:$0xff] }
  0x7c   :  { %v4778_v46 = vld [vmem:[#allocation5 + $0x32c] ss:$16 sps:$4 sm:$0xff]   ;;  %v4806_v4 = vld [vmem:[#allocation5 + $0x3c8] ss:$16 sps:$4 sm:$0xff]   ;;  %v4811_v5 = vld [vmem:[#allocation5 + $0x3e4] ss:$16 sps:$4 sm:$0xff]  }
  0x7d   :  { %1342 = vmatpush1.bf16.msra.mxu0 %v4675_v34  ;;  %1514 = vmatpush1.bf16.msra.mxu1 %v4676_v35  ;;  %v4755_v34 = vld [vmem:[#allocation5 + $0x2c0] ss:$16 sps:$4 sm:$0xff]   ;;  %v4758_v35 = vld [vmem:[#allocation5 + $0x2c8] ss:$16 sps:$4 sm:$0xff]   ;;  %v4784_v50 = vld [vmem:[#allocation5 + $0x34c] ss:$16 sps:$4 sm:$0xff]  }
  0x7e   :  { %1343 = vmatprep.subr.bf16.mxu0 %v4677_v36  ;;  %1515 = vmatprep.subr.bf16.mxu1 %v4679_v37  ;;  %v119_v36 = vpack.c.bf16 %v112_v33, %v105_v32  ;;  %v4763_v37 = vld [vmem:[#allocation5 + $0x2e4] ss:$16 sps:$4 sm:$0xff]   ;;  %v4844_v32 = vld [vmem:[#allocation5 + $0x48c] ss:$16 sps:$4 sm:$0xff]   ;;  %v4839_v33 = vld [vmem:[#allocation5 + $0x480] ss:$16 sps:$4 sm:$0xff]  }
  0x81   :  { %1344 = vmatpush1.bf16.msra.mxu0 %v4681_v38  ;;  %1516 = vmatpush1.bf16.msra.mxu1 %v4682_v39  ;;  %v4766_v38 = vld [vmem:[#allocation5 + $0x2ec] ss:$16 sps:$4 sm:$0xff]   ;;  %v4761_v39 = vld [vmem:[#allocation5 + $0x2e0] ss:$16 sps:$4 sm:$0xff]  }
  0x82   :  { %1345 = vmatprep.subr.bf16.mxu0 %v4683_v40  ;;  %1517 = vmatprep.subr.bf16.mxu1 %v4685_v41  ;;  %v4764_v40 = vld [vmem:[#allocation5 + $0x2e8] ss:$16 sps:$4 sm:$0xff]   ;;  %v4769_v41 = vld [vmem:[#allocation5 + $0x304] ss:$16 sps:$4 sm:$0xff]  }
  0x85   :  { %1346 = vmatpush1.bf16.msra.mxu0 %v4687_v42  ;;  %1518 = vmatpush1.bf16.msra.mxu1 %v4688_v43  ;;  %v4772_v42 = vld [vmem:[#allocation5 + $0x30c] ss:$16 sps:$4 sm:$0xff]   ;;  %v4767_v43 = vld [vmem:[#allocation5 + $0x300] ss:$16 sps:$4 sm:$0xff]  }
  0x86   :  { %1347 = vmatprep.subr.bf16.mxu0 %v4689_v44  ;;  %1519 = vmatprep.subr.bf16.mxu1 %v4691_v45  ;;  %v4770_v44 = vld [vmem:[#allocation5 + $0x308] ss:$16 sps:$4 sm:$0xff]   ;;  %v4775_v45 = vld [vmem:[#allocation5 + $0x324] ss:$16 sps:$4 sm:$0xff]  }
  0x89   :  { %1348 = vmatpush1.bf16.msra.mxu0 %v4693_v48  ;;  %1520 = vmatpush1.bf16.msra.mxu1 %v4694_v49  ;;  %v4776_v48 = vld [vmem:[#allocation5 + $0x328] ss:$16 sps:$4 sm:$0xff]   ;;  %v4781_v49 = vld [vmem:[#allocation5 + $0x344] ss:$16 sps:$4 sm:$0xff]  }
  0x8a   :  { %1349 = vmatprep.subr.bf16.mxu0 %v4695_v51  ;;  %1521 = vmatprep.subr.bf16.mxu1 %v4697_v52  ;;  %v4779_v51 = vld [vmem:[#allocation5 + $0x340] ss:$16 sps:$4 sm:$0xff]   ;;  %v4782_v52 = vld [vmem:[#allocation5 + $0x348] ss:$16 sps:$4 sm:$0xff]  }
  0x8d   :  { %1350 = vmatpush1.bf16.msra.mxu0 %v4699_v53  ;;  %1522 = vmatpush1.bf16.msra.mxu1 %v4700_v54  ;;  %v4787_v53 = vld [vmem:[#allocation5 + $0x364] ss:$16 sps:$4 sm:$0xff]   ;;  %v4790_v54 = vld [vmem:[#allocation5 + $0x36c] ss:$16 sps:$4 sm:$0xff]  }
  0x8e   :  { %1351 = vmatprep.subr.bf16.mxu0 %v4701_v55  ;;  %1523 = vmatprep.subr.bf16.mxu1 %v4703_v56  ;;  %v4785_v55 = vld [vmem:[#allocation5 + $0x360] ss:$16 sps:$4 sm:$0xff]   ;;  %v4788_v56 = vld [vmem:[#allocation5 + $0x368] ss:$16 sps:$4 sm:$0xff]  }
  0x91   :  { %1352 = vmatpush1.bf16.msra.mxu0 %v4705_v57  ;;  %1524 = vmatpush1.bf16.msra.mxu1 %v4706_v58  ;;  %v4793_v57 = vld [vmem:[#allocation5 + $0x384] ss:$16 sps:$4 sm:$0xff]   ;;  %v4796_v58 = vld [vmem:[#allocation5 + $0x38c] ss:$16 sps:$4 sm:$0xff]  }
  0x92   :  { %1353 = vmatprep.subr.bf16.mxu0 %v4707_v59  ;;  %1525 = vmatprep.subr.bf16.mxu1 %v4709_v60  ;;  %v4791_v59 = vld [vmem:[#allocation5 + $0x380] ss:$16 sps:$4 sm:$0xff]   ;;  %v4794_v60 = vld [vmem:[#allocation5 + $0x388] ss:$16 sps:$4 sm:$0xff]  }
  0x95   :  { %1354 = vmatpush1.bf16.msra.mxu0 %v4711_v61  ;;  %1526 = vmatpush1.bf16.msra.mxu1 %v4712_v62  ;;  %v4799_v61 = vld [vmem:[#allocation5 + $0x3a4] ss:$16 sps:$4 sm:$0xff]   ;;  %v4802_v62 = vld [vmem:[#allocation5 + $0x3ac] ss:$16 sps:$4 sm:$0xff]  }
  0x96   :  { %1355 = vmatprep.subr.bf16.mxu0 %v4713_v63  ;;  %1527 = vmatprep.subr.bf16.mxu1 %v4715_v0  ;;  %v4797_v63 = vld [vmem:[#allocation5 + $0x3a0] ss:$16 sps:$4 sm:$0xff]   ;;  %v4800_v0 = vld [vmem:[#allocation5 + $0x3a8] ss:$16 sps:$4 sm:$0xff]  }
  0x99   :  { %1356 = vmatpush1.bf16.msra.mxu0 %v4717_v1  ;;  %1528 = vmatpush1.bf16.msra.mxu1 %v4718_v2  ;;  %v4805_v1 = vld [vmem:[#allocation5 + $0x3c4] ss:$16 sps:$4 sm:$0xff]   ;;  %v4808_v2 = vld [vmem:[#allocation5 + $0x3cc] ss:$16 sps:$4 sm:$0xff]  }
  0x9a   :  { %1368 = vmatprep.subr.bf16.mxu0 %v4721_v3  ;;  %1540 = vmatprep.subr.bf16.mxu1 %v4724_v6  ;;  %v4803_v3 = vld [vmem:[#allocation5 + $0x3c0] ss:$16 sps:$4 sm:$0xff]   ;;  %v4814_v6 = vld [vmem:[#allocation5 + $0x3ec] ss:$16 sps:$4 sm:$0xff]  }
  0x9c   :  { %1358 = vmatmul.mubr.bf16.vlgmr.msra.gmra.mrb[0].mxu0 %v116_v9  ;;  %1530 = vmatmul.mubr.bf16.vlgmr.msra.gmra.mrb[0].mxu1 %v116_v9  ;;  %v4817_v9 = vld [vmem:[#allocation5 + $0x404] ss:$16 sps:$4 sm:$0xff]  }
  0x9d   :  { %1369 = vmatpush1.bf16.msra.mxu0 %v4719_v7  ;;  %1541 = vmatpush1.bf16.msra.mxu1 %v4722_v8  ;;  %v4809_v7 = vld [vmem:[#allocation5 + $0x3e0] ss:$16 sps:$4 sm:$0xff]   ;;  %v4812_v8 = vld [vmem:[#allocation5 + $0x3e8] ss:$16 sps:$4 sm:$0xff]  }
  0x9e   :  { %1370 = vmatprep.subr.bf16.mxu0 %v4727_v10  ;;  %1542 = vmatprep.subr.bf16.mxu1 %v4730_v11  ;;  %v104_v10 = vld [vmem:[#allocation2 + $0x10] sm:$0xff]  ;;  %v111_v11 = vld [vmem:[#allocation2 + $0x48] sm:$0xff] }
  0x9f   :  { %1400 = vmatprep.mubr.bf16.mxu0 %v119_v36  ;;  %1572 = vmatprep.mubr.bf16.mxu1 %v119_v36  ;;  %v4850_v36 = vld [vmem:[#allocation5 + $0x4ac] ss:$16 sps:$4 sm:$0xff]  }
  0xa1   :  { %1371 = vmatpush1.bf16.msra.mxu0 %v4725_v12  ;;  %1543 = vmatpush1.bf16.msra.mxu1 %v4728_v13  ;;  %v4820_v12 = vld [vmem:[#allocation5 + $0x40c] ss:$16 sps:$4 sm:$0xff]   ;;  %v4815_v13 = vld [vmem:[#allocation5 + $0x400] ss:$16 sps:$4 sm:$0xff]  }
  0xa2   :  { %1372 = vmatprep.subr.bf16.mxu0 %v4733_v14  ;;  %1544 = vmatprep.subr.bf16.mxu1 %v4736_v15  ;;  %v4818_v14 = vld [vmem:[#allocation5 + $0x408] ss:$16 sps:$4 sm:$0xff]   ;;  %v118_v15 = vpack.c.bf16 %v111_v11, %v104_v10  ;;  %v4907_v11 = vld [vmem:[#allocation5 + $0x5e4] ss:$16 sps:$4 sm:$0xff]  }
  0xa3   :  { %v4902_v10 = vld [vmem:[#allocation5 + $0x5c8] ss:$16 sps:$4 sm:$0xff]  }
  0xa5   :  { %1373 = vmatpush1.bf16.msra.mxu0 %v4731_v16  ;;  %1545 = vmatpush1.bf16.msra.mxu1 %v4734_v17  ;;  %v4823_v16 = vld [vmem:[#allocation5 + $0x424] ss:$16 sps:$4 sm:$0xff]   ;;  %v4826_v17 = vld [vmem:[#allocation5 + $0x42c] ss:$16 sps:$4 sm:$0xff]  }
  0xa6   :  { %1374 = vmatprep.subr.bf16.mxu0 %v4739_v18  ;;  %1546 = vmatprep.subr.bf16.mxu1 %v4742_v19  ;;  %v107_v18 = vld [vmem:[#allocation2 + $0x28] sm:$0xff]  ;;  %v4821_v19 = vld [vmem:[#allocation5 + $0x420] ss:$16 sps:$4 sm:$0xff]  }
  0xa9   :  { %1375 = vmatpush1.bf16.msra.mxu0 %v4737_v20  ;;  %1547 = vmatpush1.bf16.msra.mxu1 %v4740_v21  ;;  %v4824_v20 = vld [vmem:[#allocation5 + $0x428] ss:$16 sps:$4 sm:$0xff]   ;;  %v114_v21 = vld [vmem:[#allocation2 + $0x60] sm:$0xff] }
  0xaa   :  { %1376 = vmatprep.subr.bf16.mxu0 %v4745_v22  ;;  %1548 = vmatprep.subr.bf16.mxu1 %v4748_v23  ;;  %v4829_v22 = vld [vmem:[#allocation5 + $0x444] ss:$16 sps:$4 sm:$0xff]   ;;  %v121_v23 = vpack.c.bf16 %v114_v21, %v107_v18  ;;  %v4916_v18 = vld [vmem:[#allocation5 + $0x60c] ss:$16 sps:$4 sm:$0xff]  }
  0xad   :  { %1377 = vmatpush1.bf16.msra.mxu0 %v4743_v24  ;;  %1549 = vmatpush1.bf16.msra.mxu1 %v4746_v25  ;;  %v4832_v24 = vld [vmem:[#allocation5 + $0x44c] ss:$16 sps:$4 sm:$0xff]   ;;  %v4827_v25 = vld [vmem:[#allocation5 + $0x440] ss:$16 sps:$4 sm:$0xff]  }
  0xae   :  { %1378 = vmatprep.subr.bf16.mxu0 %v4751_v26  ;;  %1550 = vmatprep.subr.bf16.mxu1 %v4754_v27  ;;  %v4830_v26 = vld [vmem:[#allocation5 + $0x448] ss:$16 sps:$4 sm:$0xff]   ;;  %v4835_v27 = vld [vmem:[#allocation5 + $0x464] ss:$16 sps:$4 sm:$0xff]  }
  0xb1   :  { %1379 = vmatpush1.bf16.msra.mxu0 %v4749_v28  ;;  %1551 = vmatpush1.bf16.msra.mxu1 %v4752_v29  ;;  %v4838_v28 = vld [vmem:[#allocation5 + $0x46c] ss:$16 sps:$4 sm:$0xff]   ;;  %v4833_v29 = vld [vmem:[#allocation5 + $0x460] ss:$16 sps:$4 sm:$0xff]  }
  0xb2   :  { %1380 = vmatprep.subr.bf16.mxu0 %v4757_v30  ;;  %1552 = vmatprep.subr.bf16.mxu1 %v4760_v31  ;;  %v4836_v30 = vld [vmem:[#allocation5 + $0x468] ss:$16 sps:$4 sm:$0xff]   ;;  %v4841_v31 = vld [vmem:[#allocation5 + $0x484] ss:$16 sps:$4 sm:$0xff]  }
  0xb5   :  { %1381 = vmatpush1.bf16.msra.mxu0 %v4755_v34  ;;  %1553 = vmatpush1.bf16.msra.mxu1 %v4758_v35  ;;  %v4842_v34 = vld [vmem:[#allocation5 + $0x488] ss:$16 sps:$4 sm:$0xff]   ;;  %v4847_v35 = vld [vmem:[#allocation5 + $0x4a4] ss:$16 sps:$4 sm:$0xff]  }
  0xb6   :  { %1382 = vmatprep.subr.bf16.mxu0 %v4763_v37  ;;  %1554 = vmatprep.subr.bf16.mxu1 %v4766_v38  ;;  %v4845_v37 = vld [vmem:[#allocation5 + $0x4a0] ss:$16 sps:$4 sm:$0xff]   ;;  %v4848_v38 = vld [vmem:[#allocation5 + $0x4a8] ss:$16 sps:$4 sm:$0xff]  }
  0xb9   :  { %1383 = vmatpush1.bf16.msra.mxu0 %v4761_v39  ;;  %1555 = vmatpush1.bf16.msra.mxu1 %v4764_v40  ;;  %v4853_v39 = vld [vmem:[#allocation5 + $0x4c4] ss:$16 sps:$4 sm:$0xff]   ;;  %v4856_v40 = vld [vmem:[#allocation5 + $0x4cc] ss:$16 sps:$4 sm:$0xff]  }
  0xba   :  { %1384 = vmatprep.subr.bf16.mxu0 %v4769_v41  ;;  %1556 = vmatprep.subr.bf16.mxu1 %v4772_v42  ;;  %v4851_v41 = vld [vmem:[#allocation5 + $0x4c0] ss:$16 sps:$4 sm:$0xff]   ;;  %v4854_v42 = vld [vmem:[#allocation5 + $0x4c8] ss:$16 sps:$4 sm:$0xff]  }
  0xbd   :  { %1385 = vmatpush1.bf16.msra.mxu0 %v4767_v43  ;;  %1557 = vmatpush1.bf16.msra.mxu1 %v4770_v44  ;;  %v4859_v43 = vld [vmem:[#allocation5 + $0x4e4] ss:$16 sps:$4 sm:$0xff]   ;;  %v4862_v44 = vld [vmem:[#allocation5 + $0x4ec] ss:$16 sps:$4 sm:$0xff]  }
  0xbe   :  { %1386 = vmatprep.subr.bf16.mxu0 %v4775_v45  ;;  %1558 = vmatprep.subr.bf16.mxu1 %v4778_v46  ;;  %v4857_v45 = vld [vmem:[#allocation5 + $0x4e0] ss:$16 sps:$4 sm:$0xff]   ;;  %v4860_v46 = vld [vmem:[#allocation5 + $0x4e8] ss:$16 sps:$4 sm:$0xff]  }
  0xc1   :  { %1387 = vmatpush1.bf16.msra.mxu0 %v4773_v47  ;;  %1559 = vmatpush1.bf16.msra.mxu1 %v4776_v48  ;;  %v4865_v47 = vld [vmem:[#allocation5 + $0x504] ss:$16 sps:$4 sm:$0xff]   ;;  %v4868_v48 = vld [vmem:[#allocation5 + $0x50c] ss:$16 sps:$4 sm:$0xff]  }
  0xc2   :  { %1388 = vmatprep.subr.bf16.mxu0 %v4781_v49  ;;  %1560 = vmatprep.subr.bf16.mxu1 %v4784_v50  ;;  %v4863_v49 = vld [vmem:[#allocation5 + $0x500] ss:$16 sps:$4 sm:$0xff]   ;;  %v4866_v50 = vld [vmem:[#allocation5 + $0x508] ss:$16 sps:$4 sm:$0xff]  }
  0xc5   :  { %1389 = vmatpush1.bf16.msra.mxu0 %v4779_v51  ;;  %1561 = vmatpush1.bf16.msra.mxu1 %v4782_v52  ;;  %v4871_v51 = vld [vmem:[#allocation5 + $0x524] ss:$16 sps:$4 sm:$0xff]   ;;  %v4874_v52 = vld [vmem:[#allocation5 + $0x52c] ss:$16 sps:$4 sm:$0xff]  }
  0xc6   :  { %1390 = vmatprep.subr.bf16.mxu0 %v4787_v53  ;;  %1562 = vmatprep.subr.bf16.mxu1 %v4790_v54  ;;  %v4869_v53 = vld [vmem:[#allocation5 + $0x520] ss:$16 sps:$4 sm:$0xff]   ;;  %v4872_v54 = vld [vmem:[#allocation5 + $0x528] ss:$16 sps:$4 sm:$0xff]  }
  0xc9   :  { %1391 = vmatpush1.bf16.msra.mxu0 %v4785_v55  ;;  %1563 = vmatpush1.bf16.msra.mxu1 %v4788_v56  ;;  %v4877_v55 = vld [vmem:[#allocation5 + $0x544] ss:$16 sps:$4 sm:$0xff]   ;;  %v4880_v56 = vld [vmem:[#allocation5 + $0x54c] ss:$16 sps:$4 sm:$0xff]  }
  0xca   :  { %1392 = vmatprep.subr.bf16.mxu0 %v4793_v57  ;;  %1564 = vmatprep.subr.bf16.mxu1 %v4796_v58  ;;  %v4875_v57 = vld [vmem:[#allocation5 + $0x540] ss:$16 sps:$4 sm:$0xff]   ;;  %v4878_v58 = vld [vmem:[#allocation5 + $0x548] ss:$16 sps:$4 sm:$0xff]  }
  0xcd   :  { %1393 = vmatpush1.bf16.msra.mxu0 %v4791_v59  ;;  %1565 = vmatpush1.bf16.msra.mxu1 %v4794_v60  ;;  %v4883_v59 = vld [vmem:[#allocation5 + $0x564] ss:$16 sps:$4 sm:$0xff]   ;;  %v4886_v60 = vld [vmem:[#allocation5 + $0x56c] ss:$16 sps:$4 sm:$0xff]  }
  0xce   :  { %1394 = vmatprep.subr.bf16.mxu0 %v4799_v61  ;;  %1566 = vmatprep.subr.bf16.mxu1 %v4802_v62  ;;  %v4881_v61 = vld [vmem:[#allocation5 + $0x560] ss:$16 sps:$4 sm:$0xff]   ;;  %v4884_v62 = vld [vmem:[#allocation5 + $0x568] ss:$16 sps:$4 sm:$0xff]  }
  0xd1   :  { %1395 = vmatpush1.bf16.msra.mxu0 %v4797_v63  ;;  %1567 = vmatpush1.bf16.msra.mxu1 %v4800_v0  ;;  %v4889_v63 = vld [vmem:[#allocation5 + $0x584] ss:$16 sps:$4 sm:$0xff]   ;;  %v4892_v0 = vld [vmem:[#allocation5 + $0x58c] ss:$16 sps:$4 sm:$0xff]  }
  0xd2   :  { %1396 = vmatprep.subr.bf16.mxu0 %v4805_v1  ;;  %1568 = vmatprep.subr.bf16.mxu1 %v4808_v2  ;;  %v4887_v1 = vld [vmem:[#allocation5 + $0x580] ss:$16 sps:$4 sm:$0xff]   ;;  %v4890_v2 = vld [vmem:[#allocation5 + $0x588] ss:$16 sps:$4 sm:$0xff]  }
  0xd5   :  { %1397 = vmatpush1.bf16.msra.mxu0 %v4803_v3  ;;  %1569 = vmatpush1.bf16.msra.mxu1 %v4806_v4  ;;  %v4895_v3 = vld [vmem:[#allocation5 + $0x5a4] ss:$16 sps:$4 sm:$0xff]   ;;  %v4898_v4 = vld [vmem:[#allocation5 + $0x5ac] ss:$16 sps:$4 sm:$0xff]  }
  0xd6   :  { %1398 = vmatprep.subr.bf16.mxu0 %v4811_v5  ;;  %1570 = vmatprep.subr.bf16.mxu1 %v4814_v6  ;;  %v4893_v5 = vld [vmem:[#allocation5 + $0x5a0] ss:$16 sps:$4 sm:$0xff]   ;;  %v4896_v6 = vld [vmem:[#allocation5 + $0x5a8] ss:$16 sps:$4 sm:$0xff]  }
  0xd9   :  { %1399 = vmatpush1.bf16.msra.mxu0 %v4809_v7  ;;  %1571 = vmatpush1.bf16.msra.mxu1 %v4812_v8  ;;  %v4901_v7 = vld [vmem:[#allocation5 + $0x5c4] ss:$16 sps:$4 sm:$0xff]   ;;  %v4904_v8 = vld [vmem:[#allocation5 + $0x5cc] ss:$16 sps:$4 sm:$0xff]  }
  0xda   :  { %1411 = vmatprep.subr.bf16.mxu0 %v4817_v9  ;;  %1583 = vmatprep.subr.bf16.mxu1 %v4820_v12  ;;  %v4899_v9 = vld [vmem:[#allocation5 + $0x5c0] ss:$16 sps:$4 sm:$0xff]   ;;  %v4910_v12 = vld [vmem:[#allocation5 + $0x5ec] ss:$16 sps:$4 sm:$0xff]  }
  0xdc   :  { %1401 = vmatmul.mubr.bf16.vlgmr.msra.gmra.mrb[0].mxu0 %v118_v15  ;;  %1573 = vmatmul.mubr.bf16.vlgmr.msra.gmra.mrb[0].mxu1 %v118_v15  ;;  %v106_v15 = vld [vmem:[#allocation2 + $0x20] sm:$0xff] }
  0xdd   :  { %1412 = vmatpush1.bf16.msra.mxu0 %v4815_v13  ;;  %1584 = vmatpush1.bf16.msra.mxu1 %v4818_v14  ;;  %v4905_v13 = vld [vmem:[#allocation5 + $0x5e0] ss:$16 sps:$4 sm:$0xff]   ;;  %v4908_v14 = vld [vmem:[#allocation5 + $0x5e8] ss:$16 sps:$4 sm:$0xff]  }
  0xde   :  { %1413 = vmatprep.subr.bf16.mxu0 %v4823_v16  ;;  %1585 = vmatprep.subr.bf16.mxu1 %v4826_v17  ;;  %v113_v16 = vld [vmem:[#allocation2 + $0x58] sm:$0xff]  ;;  %v4913_v17 = vld [vmem:[#allocation5 + $0x604] ss:$16 sps:$4 sm:$0xff]  }
  0xdf   :  { %1443 = vmatprep.mubr.bf16.mxu0 %v121_v23  ;;  %1615 = vmatprep.mubr.bf16.mxu1 %v121_v23  ;;  %v120_v21 = vpack.c.bf16 %v113_v16, %v106_v15  ;;  %v4922_v23 = vld [vmem:[#allocation7 + $0xc] ss:$16 sps:$4 sm:$0xff]   ;;  %v4995_v16 = vld [vmem:[#allocation7 + $0x1a0] ss:$16 sps:$4 sm:$0xff]  }
  0xe0   :  { %v5000_v15 = vld [vmem:[#allocation7 + $0x1ac] ss:$16 sps:$4 sm:$0xff]  }
  0xe1   :  { %1414 = vmatpush1.bf16.msra.mxu0 %v4821_v19  ;;  %1586 = vmatpush1.bf16.msra.mxu1 %v4824_v20  ;;  %v4911_v19 = vld [vmem:[#allocation5 + $0x600] ss:$16 sps:$4 sm:$0xff]   ;;  %v4914_v20 = vld [vmem:[#allocation5 + $0x608] ss:$16 sps:$4 sm:$0xff]  }
  0xe2   :  { %1415 = vmatprep.subr.bf16.mxu0 %v4829_v22  ;;  %1587 = vmatprep.subr.bf16.mxu1 %v4832_v24  ;;  %v4919_v22 = vld [vmem:[#allocation7 + $0x4] ss:$16 sps:$4 sm:$0xff]   ;;  %v5492_v24 = vmov 0  }
  0xe5   :  { %1416 = vmatpush1.bf16.msra.mxu0 %v4827_v25  ;;  %1588 = vmatpush1.bf16.msra.mxu1 %v4830_v26  ;;  %v108_v25 = vld [vmem:[#allocation2 + $0x30] sm:$0xff]  ;;  %v115_v26 = vld [vmem:[#allocation2 + $0x68] sm:$0xff] }
  0xe6   :  { %1417 = vmatprep.subr.bf16.mxu0 %v4835_v27  ;;  %1589 = vmatprep.subr.bf16.mxu1 %v4838_v28  ;;  %v4917_v27 = vld [vmem:[#allocation7] ss:$16 sps:$4 sm:$0xff]   ;;  %v4920_v28 = vld [vmem:[#allocation7 + $0x8] ss:$16 sps:$4 sm:$0xff]  }
  0xe9   :  { %1418 = vmatpush1.bf16.msra.mxu0 %v4833_v29  ;;  %1590 = vmatpush1.bf16.msra.mxu1 %v4836_v30  ;;  %v122_v29 = vpack.c.bf16 %v115_v26, %v108_v25  ;;  %v4925_v30 = vld [vmem:[#allocation7 + $0x24] ss:$16 sps:$4 sm:$0xff]   ;;  %v5010_v25 = vld [vmem:[#allocation7 + $0x1e8] ss:$16 sps:$4 sm:$0xff]  }
  0xea   :  { %1419 = vmatprep.subr.bf16.mxu0 %v4841_v31  ;;  %1591 = vmatprep.subr.bf16.mxu1 %v4844_v32  ;;  %v4928_v31 = vld [vmem:[#allocation7 + $0x2c] ss:$16 sps:$4 sm:$0xff]   ;;  %v4923_v32 = vld [vmem:[#allocation7 + $0x20] ss:$16 sps:$4 sm:$0xff]   ;;  %v5015_v26 = vld [vmem:[#allocation7 + $0x204] ss:$16 sps:$4 sm:$0xff]  }
  0xed   :  { %1420 = vmatpush1.bf16.msra.mxu0 %v4839_v33  ;;  %1592 = vmatpush1.bf16.msra.mxu1 %v4842_v34  ;;  %v4926_v33 = vld [vmem:[#allocation7 + $0x28] ss:$16 sps:$4 sm:$0xff]   ;;  %v4931_v34 = vld [vmem:[#allocation7 + $0x44] ss:$16 sps:$4 sm:$0xff]  }
  0xee   :  { %1421 = vmatprep.subr.bf16.mxu0 %v4847_v35  ;;  %1593 = vmatprep.subr.bf16.mxu1 %v4850_v36  ;;  %v4934_v35 = vld [vmem:[#allocation7 + $0x4c] ss:$16 sps:$4 sm:$0xff]   ;;  %v4929_v36 = vld [vmem:[#allocation7 + $0x40] ss:$16 sps:$4 sm:$0xff]  }
  0xf1   :  { %1422 = vmatpush1.bf16.msra.mxu0 %v4845_v37  ;;  %1594 = vmatpush1.bf16.msra.mxu1 %v4848_v38  ;;  %v4932_v37 = vld [vmem:[#allocation7 + $0x48] ss:$16 sps:$4 sm:$0xff]   ;;  %v4937_v38 = vld [vmem:[#allocation7 + $0x64] ss:$16 sps:$4 sm:$0xff]  }
  0xf2   :  { %1423 = vmatprep.subr.bf16.mxu0 %v4853_v39  ;;  %1595 = vmatprep.subr.bf16.mxu1 %v4856_v40  ;;  %v4940_v39 = vld [vmem:[#allocation7 + $0x6c] ss:$16 sps:$4 sm:$0xff]   ;;  %v4935_v40 = vld [vmem:[#allocation7 + $0x60] ss:$16 sps:$4 sm:$0xff]  }
  0xf5   :  { %1424 = vmatpush1.bf16.msra.mxu0 %v4851_v41  ;;  %1596 = vmatpush1.bf16.msra.mxu1 %v4854_v42  ;;  %v4938_v41 = vld [vmem:[#allocation7 + $0x68] ss:$16 sps:$4 sm:$0xff]   ;;  %v4943_v42 = vld [vmem:[#allocation7 + $0x84] ss:$16 sps:$4 sm:$0xff]  }
  0xf6   :  { %1425 = vmatprep.subr.bf16.mxu0 %v4859_v43  ;;  %1597 = vmatprep.subr.bf16.mxu1 %v4862_v44  ;;  %v4946_v43 = vld [vmem:[#allocation7 + $0x8c] ss:$16 sps:$4 sm:$0xff]   ;;  %v4941_v44 = vld [vmem:[#allocation7 + $0x80] ss:$16 sps:$4 sm:$0xff]  }
  0xf9   :  { %1426 = vmatpush1.bf16.msra.mxu0 %v4857_v45  ;;  %1598 = vmatpush1.bf16.msra.mxu1 %v4860_v46  ;;  %v4944_v45 = vld [vmem:[#allocation7 + $0x88] ss:$16 sps:$4 sm:$0xff]   ;;  %v4949_v46 = vld [vmem:[#allocation7 + $0xa4] ss:$16 sps:$4 sm:$0xff]  }
  0xfa   :  { %1427 = vmatprep.subr.bf16.mxu0 %v4865_v47  ;;  %1599 = vmatprep.subr.bf16.mxu1 %v4868_v48  ;;  %v4952_v47 = vld [vmem:[#allocation7 + $0xac] ss:$16 sps:$4 sm:$0xff]   ;;  %v4947_v48 = vld [vmem:[#allocation7 + $0xa0] ss:$16 sps:$4 sm:$0xff]  }
  0xfd   :  { %1428 = vmatpush1.bf16.msra.mxu0 %v4863_v49  ;;  %1600 = vmatpush1.bf16.msra.mxu1 %v4866_v50  ;;  %v4950_v49 = vld [vmem:[#allocation7 + $0xa8] ss:$16 sps:$4 sm:$0xff]   ;;  %v4955_v50 = vld [vmem:[#allocation7 + $0xc4] ss:$16 sps:$4 sm:$0xff]  }
  0xfe   :  { %1429 = vmatprep.subr.bf16.mxu0 %v4871_v51  ;;  %1601 = vmatprep.subr.bf16.mxu1 %v4874_v52  ;;  %v4958_v51 = vld [vmem:[#allocation7 + $0xcc] ss:$16 sps:$4 sm:$0xff]   ;;  %v4953_v52 = vld [vmem:[#allocation7 + $0xc0] ss:$16 sps:$4 sm:$0xff]  }
 0x101   :  { %1430 = vmatpush1.bf16.msra.mxu0 %v4869_v53  ;;  %1602 = vmatpush1.bf16.msra.mxu1 %v4872_v54  ;;  %v4956_v53 = vld [vmem:[#allocation7 + $0xc8] ss:$16 sps:$4 sm:$0xff]   ;;  %v4961_v54 = vld [vmem:[#allocation7 + $0xe4] ss:$16 sps:$4 sm:$0xff]  }
 0x102   :  { %1431 = vmatprep.subr.bf16.mxu0 %v4877_v55  ;;  %1603 = vmatprep.subr.bf16.mxu1 %v4880_v56  ;;  %v4964_v55 = vld [vmem:[#allocation7 + $0xec] ss:$16 sps:$4 sm:$0xff]   ;;  %v4959_v56 = vld [vmem:[#allocation7 + $0xe0] ss:$16 sps:$4 sm:$0xff]  }
 0x105   :  { %1432 = vmatpush1.bf16.msra.mxu0 %v4875_v57  ;;  %1604 = vmatpush1.bf16.msra.mxu1 %v4878_v58  ;;  %v4962_v57 = vld [vmem:[#allocation7 + $0xe8] ss:$16 sps:$4 sm:$0xff]   ;;  %v4967_v58 = vld [vmem:[#allocation7 + $0x104] ss:$16 sps:$4 sm:$0xff]  }
 0x106   :  { %1433 = vmatprep.subr.bf16.mxu0 %v4883_v59  ;;  %1605 = vmatprep.subr.bf16.mxu1 %v4886_v60  ;;  %v4970_v59 = vld [vmem:[#allocation7 + $0x10c] ss:$16 sps:$4 sm:$0xff]   ;;  %v4965_v60 = vld [vmem:[#allocation7 + $0x100] ss:$16 sps:$4 sm:$0xff]  }
 0x109   :  { %1434 = vmatpush1.bf16.msra.mxu0 %v4881_v61  ;;  %1606 = vmatpush1.bf16.msra.mxu1 %v4884_v62  ;;  %v4968_v61 = vld [vmem:[#allocation7 + $0x108] ss:$16 sps:$4 sm:$0xff]   ;;  %v4973_v62 = vld [vmem:[#allocation7 + $0x124] ss:$16 sps:$4 sm:$0xff]  }
 0x10a   :  { %1435 = vmatprep.subr.bf16.mxu0 %v4889_v63  ;;  %1607 = vmatprep.subr.bf16.mxu1 %v4892_v0  ;;  %v4976_v63 = vld [vmem:[#allocation7 + $0x12c] ss:$16 sps:$4 sm:$0xff]   ;;  %v4971_v0 = vld [vmem:[#allocation7 + $0x120] ss:$16 sps:$4 sm:$0xff]  }
 0x10d   :  { %1436 = vmatpush1.bf16.msra.mxu0 %v4887_v1  ;;  %1608 = vmatpush1.bf16.msra.mxu1 %v4890_v2  ;;  %v4974_v1 = vld [vmem:[#allocation7 + $0x128] ss:$16 sps:$4 sm:$0xff]   ;;  %v4979_v2 = vld [vmem:[#allocation7 + $0x144] ss:$16 sps:$4 sm:$0xff]  }
 0x10e   :  { %1437 = vmatprep.subr.bf16.mxu0 %v4895_v3  ;;  %1609 = vmatprep.subr.bf16.mxu1 %v4898_v4  ;;  %v4982_v3 = vld [vmem:[#allocation7 + $0x14c] ss:$16 sps:$4 sm:$0xff]   ;;  %v4977_v4 = vld [vmem:[#allocation7 + $0x140] ss:$16 sps:$4 sm:$0xff]  }
 0x111   :  { %1438 = vmatpush1.bf16.msra.mxu0 %v4893_v5  ;;  %1610 = vmatpush1.bf16.msra.mxu1 %v4896_v6  ;;  %v4980_v5 = vld [vmem:[#allocation7 + $0x148] ss:$16 sps:$4 sm:$0xff]   ;;  %v4985_v6 = vld [vmem:[#allocation7 + $0x164] ss:$16 sps:$4 sm:$0xff]  }
 0x112   :  { %1439 = vmatprep.subr.bf16.mxu0 %v4901_v7  ;;  %1611 = vmatprep.subr.bf16.mxu1 %v4904_v8  ;;  %v4988_v7 = vld [vmem:[#allocation7 + $0x16c] ss:$16 sps:$4 sm:$0xff]   ;;  %v4983_v8 = vld [vmem:[#allocation7 + $0x160] ss:$16 sps:$4 sm:$0xff]  }
 0x115   :  { %1440 = vmatpush1.bf16.msra.mxu0 %v4899_v9  ;;  %1612 = vmatpush1.bf16.msra.mxu1 %v4902_v10  ;;  %v4986_v9 = vld [vmem:[#allocation7 + $0x168] ss:$16 sps:$4 sm:$0xff]   ;;  %v4991_v10 = vld [vmem:[#allocation7 + $0x184] ss:$16 sps:$4 sm:$0xff]  }
 0x116   :  { %1441 = vmatprep.subr.bf16.mxu0 %v4907_v11  ;;  %1613 = vmatprep.subr.bf16.mxu1 %v4910_v12  ;;  %v4994_v11 = vld [vmem:[#allocation7 + $0x18c] ss:$16 sps:$4 sm:$0xff]   ;;  %v4989_v12 = vld [vmem:[#allocation7 + $0x180] ss:$16 sps:$4 sm:$0xff]  }
 0x119   :  { %1442 = vmatpush1.bf16.msra.mxu0 %v4905_v13  ;;  %1614 = vmatpush1.bf16.msra.mxu1 %v4908_v14  ;;  %v4992_v13 = vld [vmem:[#allocation7 + $0x188] ss:$16 sps:$4 sm:$0xff]   ;;  %v4997_v14 = vld [vmem:[#allocation7 + $0x1a4] ss:$16 sps:$4 sm:$0xff]  }
 0x11a   :  { %1454 = vmatprep.subr.bf16.mxu0 %v4913_v17  ;;  %1626 = vmatprep.subr.bf16.mxu1 %v4916_v18  ;;  %v4998_v17 = vld [vmem:[#allocation7 + $0x1a8] ss:$16 sps:$4 sm:$0xff]   ;;  %v5003_v18 = vld [vmem:[#allocation7 + $0x1c4] ss:$16 sps:$4 sm:$0xff]  }
 0x11c   :  { %1444 = vmatmul.mubr.bf16.vlgmr.msra.gmra.mrb[0].mxu0 %v120_v21  ;;  %1616 = vmatmul.mubr.bf16.vlgmr.msra.gmra.mrb[0].mxu1 %v120_v21  ;;  %v5004_v21 = vld [vmem:[#allocation7 + $0x1c8] ss:$16 sps:$4 sm:$0xff]  }
 0x11d   :  { %1455 = vmatpush1.bf16.msra.mxu0 %v4911_v19  ;;  %1627 = vmatpush1.bf16.msra.mxu1 %v4914_v20  ;;  %v5006_v19 = vld [vmem:[#allocation7 + $0x1cc] ss:$16 sps:$4 sm:$0xff]   ;;  %v5001_v20 = vld [vmem:[#allocation7 + $0x1c0] ss:$16 sps:$4 sm:$0xff]  }
 0x11e   :  { %1486 = vmatprep.mubr.bf16.mxu0 %v5492_v24  ;;  %1658 = vmatprep.mubr.bf16.mxu1 %v5492_v24  ;;  %v5007_v24 = vld [vmem:[#allocation7 + $0x1e0] ss:$16 sps:$4 sm:$0xff]  }
 0x11f   :  { %2471 = vmatprep.subr.bf16.mxu0 %v4919_v22  ;;  %2557 = vmatprep.subr.bf16.mxu1 %v4922_v23  ;;  %v5009_v22 = vld [vmem:[#allocation7 + $0x1e4] ss:$16 sps:$4 sm:$0xff]   ;;  %v5012_v23 = vld [vmem:[#allocation7 + $0x1ec] ss:$16 sps:$4 sm:$0xff]  }
 0x128   :  { %4209 = vmatmul.mubr.msk.bf16.vlgmr.msra.gmra.mrb[0].mxu0 %vm1321_vm0, %v122_v29  ;;  %4210 = vmatmul.mubr.msk.bf16.vlgmr.msra.gmra.mrb[0].mxu1 %vm1321_vm0, %v122_v29 }
 0x129   :  { %2472 = vmatpush1.bf16.msra.mxu0 %v4917_v27  ;;  %2558 = vmatpush1.bf16.msra.mxu1 %v4920_v28  ;;  %v5018_v27 = vld [vmem:[#allocation7 + $0x20c] ss:$16 sps:$4 sm:$0xff]   ;;  %v321_v28 = vlaneseq }
 0x12a   :  { %2473 = vmatprep.subr.bf16.mxu0 %v4925_v30  ;;  %2559 = vmatprep.subr.bf16.mxu1 %v4928_v31 }
 0x12b   :  { %v322_v29 = vshrl.u32 %v321_v28, 7  ;;  %v5052_v28 = vld [vmem:[#allocation7 + $0x2c8] ss:$16 sps:$4 sm:$0xff]  }
 0x12d   :  { %2474 = vmatpush1.bf16.msra.mxu0 %v4923_v32  ;;  %2560 = vmatpush1.bf16.msra.mxu1 %v4926_v33  ;;  %v5615_v30 = vsub.s32 0, %v322_v29  ;;  %v5617_v31 = vsub.s32 2, %v322_v29  ;;  %v319_v32 = vld [vmem:[%s5669_s2] sm:$0xf]  ;;  %v5622_v33 = vsub.s32 1, %v322_v29 }
 0x12e   :  { %2475 = vmatprep.subr.bf16.mxu0 %v4931_v34  ;;  %2561 = vmatprep.subr.bf16.mxu1 %v4934_v35  ;;  %v5624_v34 = vsub.s32 3, %v322_v29  ;;  %v5057_v29 = vld [vmem:[#allocation7 + $0x2e4] ss:$16 sps:$4 sm:$0xff]  }
 0x12f   :  { %v324_v35 = vrot.slane %v319_v32, %v5615_v30 }
 0x131   :  { %2476 = vmatpush1.bf16.msra.mxu0 %v4929_v36  ;;  %2562 = vmatpush1.bf16.msra.mxu1 %v4932_v37  ;;  %v332_v36 = vrot.slane %v319_v32, %v5617_v31  ;;  %v328_v37 = vrot.slane %v319_v32, %v5622_v33 }
 0x132   :  { %2477 = vmatprep.subr.bf16.mxu0 %v4937_v38  ;;  %2563 = vmatprep.subr.bf16.mxu1 %v4940_v39  ;;  %v336_v38 = vrot.slane %v319_v32, %v5624_v34  ;;  %v5060_v32 = vld [vmem:[#allocation7 + $0x2ec] ss:$16 sps:$4 sm:$0xff]  }
 0x135   :  { %2478 = vmatpush1.bf16.msra.mxu0 %v4935_v40  ;;  %2564 = vmatpush1.bf16.msra.mxu1 %v4938_v41 }
 0x136   :  { %2479 = vmatprep.subr.bf16.mxu0 %v4943_v42  ;;  %2565 = vmatprep.subr.bf16.mxu1 %v4946_v43 }
 0x139   :  { %2480 = vmatpush1.bf16.msra.mxu0 %v4941_v44  ;;  %2566 = vmatpush1.bf16.msra.mxu1 %v4944_v45 }
 0x13a   :  { %2481 = vmatprep.subr.bf16.mxu0 %v4949_v46  ;;  %2567 = vmatprep.subr.bf16.mxu1 %v4952_v47 }
 0x13d   :  { %2482 = vmatpush1.bf16.msra.mxu0 %v4947_v48  ;;  %2568 = vmatpush1.bf16.msra.mxu1 %v4950_v49 }
 0x13e   :  { %2483 = vmatprep.subr.bf16.mxu0 %v4955_v50  ;;  %2569 = vmatprep.subr.bf16.mxu1 %v4958_v51 }
 0x141   :  { %2484 = vmatpush1.bf16.msra.mxu0 %v4953_v52  ;;  %2570 = vmatpush1.bf16.msra.mxu1 %v4956_v53 }
 0x142   :  { %2485 = vmatprep.subr.bf16.mxu0 %v4961_v54  ;;  %2571 = vmatprep.subr.bf16.mxu1 %v4964_v55 }
 0x145   :  { %2486 = vmatpush1.bf16.msra.mxu0 %v4959_v56  ;;  %2572 = vmatpush1.bf16.msra.mxu1 %v4962_v57 }
 0x146   :  { %2487 = vmatprep.subr.bf16.mxu0 %v4967_v58  ;;  %2573 = vmatprep.subr.bf16.mxu1 %v4970_v59 }
 0x149   :  { %2488 = vmatpush1.bf16.msra.mxu0 %v4965_v60  ;;  %2574 = vmatpush1.bf16.msra.mxu1 %v4968_v61 }
 0x14a   :  { %2489 = vmatprep.subr.bf16.mxu0 %v4973_v62  ;;  %2575 = vmatprep.subr.bf16.mxu1 %v4976_v63 }
 0x14d   :  { %2490 = vmatpush1.bf16.msra.mxu0 %v4971_v0  ;;  %2576 = vmatpush1.bf16.msra.mxu1 %v4974_v1 }
 0x14e   :  { %2491 = vmatprep.subr.bf16.mxu0 %v4979_v2  ;;  %2577 = vmatprep.subr.bf16.mxu1 %v4982_v3  ;;  %v5013_v3 = vld [vmem:[#allocation7 + $0x200] ss:$16 sps:$4 sm:$0xff]  }
 0x151   :  { %2492 = vmatpush1.bf16.msra.mxu0 %v4977_v4  ;;  %2578 = vmatpush1.bf16.msra.mxu1 %v4980_v5  ;;  %v5016_v4 = vld [vmem:[#allocation7 + $0x208] ss:$16 sps:$4 sm:$0xff]   ;;  %v5021_v5 = vld [vmem:[#allocation7 + $0x224] ss:$16 sps:$4 sm:$0xff]  }
 0x152   :  { %2493 = vmatprep.subr.bf16.mxu0 %v4985_v6  ;;  %2579 = vmatprep.subr.bf16.mxu1 %v4988_v7  ;;  %v5024_v6 = vld [vmem:[#allocation7 + $0x22c] ss:$16 sps:$4 sm:$0xff]   ;;  %v5019_v7 = vld [vmem:[#allocation7 + $0x220] ss:$16 sps:$4 sm:$0xff]  }
 0x155   :  { %2494 = vmatpush1.bf16.msra.mxu0 %v4983_v8  ;;  %2580 = vmatpush1.bf16.msra.mxu1 %v4986_v9  ;;  %v5022_v8 = vld [vmem:[#allocation7 + $0x228] ss:$16 sps:$4 sm:$0xff]   ;;  %v5027_v9 = vld [vmem:[#allocation7 + $0x244] ss:$16 sps:$4 sm:$0xff]  }
 0x156   :  { %2495 = vmatprep.subr.bf16.mxu0 %v4991_v10  ;;  %2581 = vmatprep.subr.bf16.mxu1 %v4994_v11  ;;  %v5030_v10 = vld [vmem:[#allocation7 + $0x24c] ss:$16 sps:$4 sm:$0xff]   ;;  %v5025_v11 = vld [vmem:[#allocation7 + $0x240] ss:$16 sps:$4 sm:$0xff]  }
 0x159   :  { %2496 = vmatpush1.bf16.msra.mxu0 %v4989_v12  ;;  %2582 = vmatpush1.bf16.msra.mxu1 %v4992_v13  ;;  %v5028_v12 = vld [vmem:[#allocation7 + $0x248] ss:$16 sps:$4 sm:$0xff]   ;;  %v5033_v13 = vld [vmem:[#allocation7 + $0x264] ss:$16 sps:$4 sm:$0xff]  }
 0x15a   :  { %2497 = vmatprep.subr.bf16.mxu0 %v4997_v14  ;;  %2583 = vmatprep.subr.bf16.mxu1 %v5000_v15  ;;  %v5036_v14 = vld [vmem:[#allocation7 + $0x26c] ss:$16 sps:$4 sm:$0xff]   ;;  %v5031_v15 = vld [vmem:[#allocation7 + $0x260] ss:$16 sps:$4 sm:$0xff]  }
 0x15d   :  { %2498 = vmatpush1.bf16.msra.mxu0 %v4995_v16  ;;  %2584 = vmatpush1.bf16.msra.mxu1 %v4998_v17  ;;  %v5034_v16 = vld [vmem:[#allocation7 + $0x268] ss:$16 sps:$4 sm:$0xff]   ;;  %v5039_v17 = vld [vmem:[#allocation7 + $0x284] ss:$16 sps:$4 sm:$0xff]  }
 0x15e   :  { %2499 = vmatprep.subr.bf16.mxu0 %v5003_v18  ;;  %2585 = vmatprep.subr.bf16.mxu1 %v5006_v19  ;;  %v5042_v18 = vld [vmem:[#allocation7 + $0x28c] ss:$16 sps:$4 sm:$0xff]   ;;  %v5037_v19 = vld [vmem:[#allocation7 + $0x280] ss:$16 sps:$4 sm:$0xff]  }
 0x161   :  { %2500 = vmatpush1.bf16.msra.mxu0 %v5001_v20  ;;  %2586 = vmatpush1.bf16.msra.mxu1 %v5004_v21  ;;  %v5040_v20 = vld [vmem:[#allocation7 + $0x288] ss:$16 sps:$4 sm:$0xff]   ;;  %v5045_v21 = vld [vmem:[#allocation7 + $0x2a4] ss:$16 sps:$4 sm:$0xff]  }
 0x162   :  { %2501 = vmatprep.subr.bf16.mxu0 %v5009_v22  ;;  %2587 = vmatprep.subr.bf16.mxu1 %v5012_v23  ;;  %v5048_v22 = vld [vmem:[#allocation7 + $0x2ac] ss:$16 sps:$4 sm:$0xff]   ;;  %v5043_v23 = vld [vmem:[#allocation7 + $0x2a0] ss:$16 sps:$4 sm:$0xff]  }
 0x165   :  { %2502 = vmatpush1.bf16.msra.mxu0 %v5007_v24  ;;  %2588 = vmatpush1.bf16.msra.mxu1 %v5010_v25  ;;  %v5046_v24 = vld [vmem:[#allocation7 + $0x2a8] ss:$16 sps:$4 sm:$0xff]   ;;  %v5051_v25 = vld [vmem:[#allocation7 + $0x2c4] ss:$16 sps:$4 sm:$0xff]  }
 0x166   :  { %2514 = vmatprep.subr.bf16.mxu0 %v5015_v26  ;;  %2600 = vmatprep.subr.bf16.mxu1 %v5018_v27  ;;  %v5054_v26 = vld [vmem:[#allocation7 + $0x2cc] ss:$16 sps:$4 sm:$0xff]   ;;  %v5049_v27 = vld [vmem:[#allocation7 + $0x2c0] ss:$16 sps:$4 sm:$0xff]  }
 0x1fb   :  { %v1488_v39 = vpop.f32.mrb[0].mxu0  ;;  %v1660_v40 = vpop.f32.mrb[0].mxu1 }
 0x1fc   :  { %v4544_v41 = vadd.f32 %v1488_v39, %v324_v35  ;;  %v4548_v42 = vadd.f32 %v1660_v40, %v332_v36  ;;  %v1490_v43 = vpop.f32.mrb[1].mxu0  ;;  %v1662_v44 = vpop.f32.mrb[1].mxu1  ;;  %v5061_v39 = vld [vmem:[#allocation7 + $0x300] ss:$16 sps:$4 sm:$0xff]   ;;  %v5064_v40 = vld [vmem:[#allocation7 + $0x308] ss:$16 sps:$4 sm:$0xff]  }
 0x1fd   :  { %v4545_v45 = vadd.f32 %v1490_v43, %v328_v37  ;;  %v4549_v46 = vadd.f32 %v1662_v44, %v336_v38  ;;  %v1492_v47 = vpop.f32.mrb[2].mxu0  ;;  %v1664_v48 = vpop.f32.mrb[2].mxu1  ;;  %v5067_v43 = vld [vmem:[#allocation7 + $0x320] ss:$16 sps:$4 sm:$0xff]   ;;  %v5070_v44 = vld [vmem:[#allocation7 + $0x328] ss:$16 sps:$4 sm:$0xff]  }
 0x1fe   :  { %v4546_v49 = vadd.f32 %v1492_v47, %v324_v35  ;;  %v4550_v50 = vadd.f32 %v1664_v48, %v332_v36  ;;  %v1494_v51 = vpop.f32.mrb[3].mxu0  ;;  %v1666_v52 = vpop.f32.mrb[3].mxu1  ;;  %v1669_v55 = vmax.f32 %v4544_v41, 0.0  ;;  %v1671_v56 = vmax.f32 %v4548_v42, 0.0  ;;  %v5055_v35 = vld [vmem:[#allocation7 + $0x2e0] ss:$16 sps:$4 sm:$0xff]  }
 0x1ff   :  { %v4547_v53 = vadd.f32 %v1494_v51, %v328_v37  ;;  %v4551_v54 = vadd.f32 %v1666_v52, %v336_v38  ;;  %v1670_v59 = vmax.f32 %v4545_v45, 0.0  ;;  %v1672_v60 = vmax.f32 %v4549_v46, 0.0  ;;  %v5058_v36 = vld [vmem:[#allocation7 + $0x2e8] ss:$16 sps:$4 sm:$0xff]   ;;  %v5063_v37 = vld [vmem:[#allocation7 + $0x304] ss:$16 sps:$4 sm:$0xff]  }
 0x200   :  { %v1673_v57 = vmax.f32 %v4546_v49, 0.0  ;;  %v1675_v58 = vmax.f32 %v4550_v50, 0.0  ;;  %v5066_v38 = vld [vmem:[#allocation7 + $0x30c] ss:$16 sps:$4 sm:$0xff]   ;;  %v5069_v41 = vld [vmem:[#allocation7 + $0x324] ss:$16 sps:$4 sm:$0xff]  }
 0x201   :  { %v1674_v61 = vmax.f32 %v4547_v53, 0.0  ;;  %v1676_v62 = vmax.f32 %v4551_v54, 0.0  ;;  %v5072_v42 = vld [vmem:[#allocation7 + $0x32c] ss:$16 sps:$4 sm:$0xff]   ;;  %v5075_v45 = vld [vmem:[#allocation7 + $0x344] ss:$16 sps:$4 sm:$0xff]  }
 0x202   :  { %v1677_v63 = vpack.c.bf16 %v1673_v57, %v1669_v55  ;;  %v5630_v0 = vpack.c.bf16 %v1675_v58, %v1671_v56  ;;  %v5078_v46 = vld [vmem:[#allocation7 + $0x34c] ss:$16 sps:$4 sm:$0xff]   ;;  %v5073_v47 = vld [vmem:[#allocation7 + $0x340] ss:$16 sps:$4 sm:$0xff]   ;;  %v5076_v48 = vld [vmem:[#allocation7 + $0x348] ss:$16 sps:$4 sm:$0xff]  }
 0x203   :  { %v1678_v1 = vpack.c.bf16 %v1674_v61, %v1670_v59  ;;  %v1680_v2 = vpack.c.bf16 %v1676_v62, %v1672_v60  ;;  %v5081_v49 = vld [vmem:[#allocation7 + $0x364] ss:$16 sps:$4 sm:$0xff]   ;;  %v5084_v50 = vld [vmem:[#allocation7 + $0x36c] ss:$16 sps:$4 sm:$0xff]   ;;  %v5079_v51 = vld [vmem:[#allocation7 + $0x360] ss:$16 sps:$4 sm:$0xff]  }
 0x204   :  { %v5082_v52 = vld [vmem:[#allocation7 + $0x368] ss:$16 sps:$4 sm:$0xff]   ;;  %v5087_v53 = vld [vmem:[#allocation7 + $0x384] ss:$16 sps:$4 sm:$0xff]   ;;  %v5090_v54 = vld [vmem:[#allocation7 + $0x38c] ss:$16 sps:$4 sm:$0xff]  }
 0x205   :  { %2503 = vmatprep.mubr.bf16.mxu0 %v1678_v1  ;;  %2589 = vmatprep.mubr.bf16.mxu1 %v1678_v1  ;;  %v5085_v55 = vld [vmem:[#allocation7 + $0x380] ss:$16 sps:$4 sm:$0xff]   ;;  %v5088_v56 = vld [vmem:[#allocation7 + $0x388] ss:$16 sps:$4 sm:$0xff]   ;;  %v5093_v57 = vld [vmem:[#allocation7 + $0x3a4] ss:$16 sps:$4 sm:$0xff]  }
 0x206   :  { %2504 = vmatmul.mubr.bf16.vlgmr.msra.gmra.mrb[4].mxu0 %v1677_v63  ;;  %2590 = vmatmul.mubr.bf16.vlgmr.msra.gmra.mrb[4].mxu1 %v1677_v63  ;;  %v5096_v58 = vld [vmem:[#allocation7 + $0x3ac] ss:$16 sps:$4 sm:$0xff]   ;;  %v5091_v59 = vld [vmem:[#allocation7 + $0x3a0] ss:$16 sps:$4 sm:$0xff]   ;;  %v5094_v60 = vld [vmem:[#allocation7 + $0x3a8] ss:$16 sps:$4 sm:$0xff]  }
 0x207   :  { %2515 = vmatpush1.bf16.msra.mxu0 %v5013_v3  ;;  %2601 = vmatpush1.bf16.msra.mxu1 %v5016_v4  ;;  %v5099_v61 = vld [vmem:[#allocation7 + $0x3c4] ss:$16 sps:$4 sm:$0xff]   ;;  %v5102_v62 = vld [vmem:[#allocation7 + $0x3cc] ss:$16 sps:$4 sm:$0xff]   ;;  %v5097_v63 = vld [vmem:[#allocation7 + $0x3c0] ss:$16 sps:$4 sm:$0xff]  }
 0x208   :  { %2546 = vmatprep.mubr.bf16.mxu0 %v1680_v2  ;;  %2632 = vmatprep.mubr.bf16.mxu1 %v1680_v2  ;;  %v5100_v1 = vld [vmem:[#allocation7 + $0x3c8] ss:$16 sps:$4 sm:$0xff]   ;;  %v5105_v2 = vld [vmem:[#allocation7 + $0x3e4] ss:$16 sps:$4 sm:$0xff]   ;;  %v5108_v3 = vld [vmem:[#allocation7 + $0x3ec] ss:$16 sps:$4 sm:$0xff]  }
 0x209   :  { %2516 = vmatprep.subr.bf16.mxu0 %v5021_v5  ;;  %2602 = vmatprep.subr.bf16.mxu1 %v5024_v6  ;;  %v5103_v4 = vld [vmem:[#allocation7 + $0x3e0] ss:$16 sps:$4 sm:$0xff]   ;;  %v5106_v5 = vld [vmem:[#allocation7 + $0x3e8] ss:$16 sps:$4 sm:$0xff]   ;;  %v5111_v6 = vld [vmem:[#allocation8 + $0x4] ss:$16 sps:$4 sm:$0xff]  }
 0x20b   :  { %2517 = vmatpush1.bf16.msra.mxu0 %v5019_v7  ;;  %2603 = vmatpush1.bf16.msra.mxu1 %v5022_v8  ;;  %v5114_v7 = vld [vmem:[#allocation8 + $0xc] ss:$16 sps:$4 sm:$0xff]   ;;  %v5109_v8 = vld [vmem:[#allocation8] ss:$16 sps:$4 sm:$0xff]  }
 0x20c   :  { %2518 = vmatprep.subr.bf16.mxu0 %v5027_v9  ;;  %2604 = vmatprep.subr.bf16.mxu1 %v5030_v10  ;;  %v5112_v9 = vld [vmem:[#allocation8 + $0x8] ss:$16 sps:$4 sm:$0xff]   ;;  %v5117_v10 = vld [vmem:[#allocation8 + $0x24] ss:$16 sps:$4 sm:$0xff]  }
 0x20f   :  { %2519 = vmatpush1.bf16.msra.mxu0 %v5025_v11  ;;  %2605 = vmatpush1.bf16.msra.mxu1 %v5028_v12  ;;  %v5120_v11 = vld [vmem:[#allocation8 + $0x2c] ss:$16 sps:$4 sm:$0xff]   ;;  %v5115_v12 = vld [vmem:[#allocation8 + $0x20] ss:$16 sps:$4 sm:$0xff]  }
 0x210   :  { %2520 = vmatprep.subr.bf16.mxu0 %v5033_v13  ;;  %2606 = vmatprep.subr.bf16.mxu1 %v5036_v14  ;;  %v5118_v13 = vld [vmem:[#allocation8 + $0x28] ss:$16 sps:$4 sm:$0xff]   ;;  %v5123_v14 = vld [vmem:[#allocation8 + $0x44] ss:$16 sps:$4 sm:$0xff]  }
 0x213   :  { %2521 = vmatpush1.bf16.msra.mxu0 %v5031_v15  ;;  %2607 = vmatpush1.bf16.msra.mxu1 %v5034_v16  ;;  %v5126_v15 = vld [vmem:[#allocation8 + $0x4c] ss:$16 sps:$4 sm:$0xff]   ;;  %v5121_v16 = vld [vmem:[#allocation8 + $0x40] ss:$16 sps:$4 sm:$0xff]  }
 0x214   :  { %2522 = vmatprep.subr.bf16.mxu0 %v5039_v17  ;;  %2608 = vmatprep.subr.bf16.mxu1 %v5042_v18  ;;  %v5124_v17 = vld [vmem:[#allocation8 + $0x48] ss:$16 sps:$4 sm:$0xff]   ;;  %v5129_v18 = vld [vmem:[#allocation8 + $0x64] ss:$16 sps:$4 sm:$0xff]  }
 0x217   :  { %2523 = vmatpush1.bf16.msra.mxu0 %v5037_v19  ;;  %2609 = vmatpush1.bf16.msra.mxu1 %v5040_v20  ;;  %v5132_v19 = vld [vmem:[#allocation8 + $0x6c] ss:$16 sps:$4 sm:$0xff]   ;;  %v5127_v20 = vld [vmem:[#allocation8 + $0x60] ss:$16 sps:$4 sm:$0xff]  }
 0x218   :  { %2524 = vmatprep.subr.bf16.mxu0 %v5045_v21  ;;  %2610 = vmatprep.subr.bf16.mxu1 %v5048_v22  ;;  %v5135_v21 = vld [vmem:[#allocation8 + $0x84] ss:$16 sps:$4 sm:$0xff]   ;;  %v5138_v22 = vld [vmem:[#allocation8 + $0x8c] ss:$16 sps:$4 sm:$0xff]  }
 0x21b   :  { %2525 = vmatpush1.bf16.msra.mxu0 %v5043_v23  ;;  %2611 = vmatpush1.bf16.msra.mxu1 %v5046_v24  ;;  %v5133_v23 = vld [vmem:[#allocation8 + $0x80] ss:$16 sps:$4 sm:$0xff]   ;;  %v5136_v24 = vld [vmem:[#allocation8 + $0x88] ss:$16 sps:$4 sm:$0xff]  }
 0x21c   :  { %2526 = vmatprep.subr.bf16.mxu0 %v5051_v25  ;;  %2612 = vmatprep.subr.bf16.mxu1 %v5054_v26  ;;  %v5141_v25 = vld [vmem:[#allocation8 + $0xa4] ss:$16 sps:$4 sm:$0xff]   ;;  %v5144_v26 = vld [vmem:[#allocation8 + $0xac] ss:$16 sps:$4 sm:$0xff]  }
 0x21f   :  { %2527 = vmatpush1.bf16.msra.mxu0 %v5049_v27  ;;  %2613 = vmatpush1.bf16.msra.mxu1 %v5052_v28  ;;  %v5139_v27 = vld [vmem:[#allocation8 + $0xa0] ss:$16 sps:$4 sm:$0xff]   ;;  %v5142_v28 = vld [vmem:[#allocation8 + $0xa8] ss:$16 sps:$4 sm:$0xff]  }
 0x220   :  { %2528 = vmatprep.subr.bf16.mxu0 %v5057_v29  ;;  %2614 = vmatprep.subr.bf16.mxu1 %v5060_v32  ;;  %v5147_v29 = vld [vmem:[#allocation8 + $0xc4] ss:$16 sps:$4 sm:$0xff]   ;;  %v5150_v32 = vld [vmem:[#allocation8 + $0xcc] ss:$16 sps:$4 sm:$0xff]  }
 0x223   :  { %2529 = vmatpush1.bf16.msra.mxu0 %v5055_v35  ;;  %2615 = vmatpush1.bf16.msra.mxu1 %v5058_v36  ;;  %v5145_v35 = vld [vmem:[#allocation8 + $0xc0] ss:$16 sps:$4 sm:$0xff]   ;;  %v5148_v36 = vld [vmem:[#allocation8 + $0xc8] ss:$16 sps:$4 sm:$0xff]  }
 0x224   :  { %2530 = vmatprep.subr.bf16.mxu0 %v5063_v37  ;;  %2616 = vmatprep.subr.bf16.mxu1 %v5066_v38  ;;  %v5153_v37 = vld [vmem:[#allocation8 + $0xe4] ss:$16 sps:$4 sm:$0xff]   ;;  %v5156_v38 = vld [vmem:[#allocation8 + $0xec] ss:$16 sps:$4 sm:$0xff]  }
 0x227   :  { %2531 = vmatpush1.bf16.msra.mxu0 %v5061_v39  ;;  %2617 = vmatpush1.bf16.msra.mxu1 %v5064_v40  ;;  %v5151_v39 = vld [vmem:[#allocation8 + $0xe0] ss:$16 sps:$4 sm:$0xff]   ;;  %v5154_v40 = vld [vmem:[#allocation8 + $0xe8] ss:$16 sps:$4 sm:$0xff]  }
 0x228   :  { %2532 = vmatprep.subr.bf16.mxu0 %v5069_v41  ;;  %2618 = vmatprep.subr.bf16.mxu1 %v5072_v42  ;;  %v5159_v41 = vld [vmem:[#allocation8 + $0x104] ss:$16 sps:$4 sm:$0xff]   ;;  %v5162_v42 = vld [vmem:[#allocation8 + $0x10c] ss:$16 sps:$4 sm:$0xff]  }
 0x22b   :  { %2533 = vmatpush1.bf16.msra.mxu0 %v5067_v43  ;;  %2619 = vmatpush1.bf16.msra.mxu1 %v5070_v44  ;;  %v5157_v43 = vld [vmem:[#allocation8 + $0x100] ss:$16 sps:$4 sm:$0xff]   ;;  %v5160_v44 = vld [vmem:[#allocation8 + $0x108] ss:$16 sps:$4 sm:$0xff]  }
 0x22c   :  { %2534 = vmatprep.subr.bf16.mxu0 %v5075_v45  ;;  %2620 = vmatprep.subr.bf16.mxu1 %v5078_v46  ;;  %v5165_v45 = vld [vmem:[#allocation8 + $0x124] ss:$16 sps:$4 sm:$0xff]   ;;  %v5168_v46 = vld [vmem:[#allocation8 + $0x12c] ss:$16 sps:$4 sm:$0xff]  }
 0x22f   :  { %2535 = vmatpush1.bf16.msra.mxu0 %v5073_v47  ;;  %2621 = vmatpush1.bf16.msra.mxu1 %v5076_v48  ;;  %v5163_v47 = vld [vmem:[#allocation8 + $0x120] ss:$16 sps:$4 sm:$0xff]   ;;  %v5166_v48 = vld [vmem:[#allocation8 + $0x128] ss:$16 sps:$4 sm:$0xff]  }
 0x230   :  { %2536 = vmatprep.subr.bf16.mxu0 %v5081_v49  ;;  %2622 = vmatprep.subr.bf16.mxu1 %v5084_v50  ;;  %v5171_v49 = vld [vmem:[#allocation8 + $0x144] ss:$16 sps:$4 sm:$0xff]   ;;  %v5174_v50 = vld [vmem:[#allocation8 + $0x14c] ss:$16 sps:$4 sm:$0xff]  }
 0x233   :  { %2537 = vmatpush1.bf16.msra.mxu0 %v5079_v51  ;;  %2623 = vmatpush1.bf16.msra.mxu1 %v5082_v52  ;;  %v5169_v51 = vld [vmem:[#allocation8 + $0x140] ss:$16 sps:$4 sm:$0xff]   ;;  %v5172_v52 = vld [vmem:[#allocation8 + $0x148] ss:$16 sps:$4 sm:$0xff]  }
 0x234   :  { %2538 = vmatprep.subr.bf16.mxu0 %v5087_v53  ;;  %2624 = vmatprep.subr.bf16.mxu1 %v5090_v54  ;;  %v5177_v53 = vld [vmem:[#allocation8 + $0x164] ss:$16 sps:$4 sm:$0xff]   ;;  %v5180_v54 = vld [vmem:[#allocation8 + $0x16c] ss:$16 sps:$4 sm:$0xff]  }
 0x237   :  { %2539 = vmatpush1.bf16.msra.mxu0 %v5085_v55  ;;  %2625 = vmatpush1.bf16.msra.mxu1 %v5088_v56  ;;  %v5175_v55 = vld [vmem:[#allocation8 + $0x160] ss:$16 sps:$4 sm:$0xff]   ;;  %v5178_v56 = vld [vmem:[#allocation8 + $0x168] ss:$16 sps:$4 sm:$0xff]  }
 0x238   :  { %2540 = vmatprep.subr.bf16.mxu0 %v5093_v57  ;;  %2626 = vmatprep.subr.bf16.mxu1 %v5096_v58  ;;  %v5183_v57 = vld [vmem:[#allocation8 + $0x184] ss:$16 sps:$4 sm:$0xff]   ;;  %v5186_v58 = vld [vmem:[#allocation8 + $0x18c] ss:$16 sps:$4 sm:$0xff]  }
 0x23b   :  { %2541 = vmatpush1.bf16.msra.mxu0 %v5091_v59  ;;  %2627 = vmatpush1.bf16.msra.mxu1 %v5094_v60  ;;  %v5181_v59 = vld [vmem:[#allocation8 + $0x180] ss:$16 sps:$4 sm:$0xff]   ;;  %v5184_v60 = vld [vmem:[#allocation8 + $0x188] ss:$16 sps:$4 sm:$0xff]  }
 0x23c   :  { %2542 = vmatprep.subr.bf16.mxu0 %v5099_v61  ;;  %2628 = vmatprep.subr.bf16.mxu1 %v5102_v62  ;;  %v5189_v61 = vld [vmem:[#allocation8 + $0x1a4] ss:$16 sps:$4 sm:$0xff]   ;;  %v5192_v62 = vld [vmem:[#allocation8 + $0x1ac] ss:$16 sps:$4 sm:$0xff]  }
 0x23f   :  { %2543 = vmatpush1.bf16.msra.mxu0 %v5097_v63  ;;  %2629 = vmatpush1.bf16.msra.mxu1 %v5100_v1  ;;  %v5187_v63 = vld [vmem:[#allocation8 + $0x1a0] ss:$16 sps:$4 sm:$0xff]   ;;  %v5190_v1 = vld [vmem:[#allocation8 + $0x1a8] ss:$16 sps:$4 sm:$0xff]  }
 0x240   :  { %2544 = vmatprep.subr.bf16.mxu0 %v5105_v2  ;;  %2630 = vmatprep.subr.bf16.mxu1 %v5108_v3  ;;  %v5195_v2 = vld [vmem:[#allocation8 + $0x1c4] ss:$16 sps:$4 sm:$0xff]   ;;  %v5198_v3 = vld [vmem:[#allocation8 + $0x1cc] ss:$16 sps:$4 sm:$0xff]  }
 0x243   :  { %2545 = vmatpush1.bf16.msra.mxu0 %v5103_v4  ;;  %2631 = vmatpush1.bf16.msra.mxu1 %v5106_v5  ;;  %v5193_v4 = vld [vmem:[#allocation8 + $0x1c0] ss:$16 sps:$4 sm:$0xff]   ;;  %v5196_v5 = vld [vmem:[#allocation8 + $0x1c8] ss:$16 sps:$4 sm:$0xff]  }
 0x244   :  { %3445 = vmatprep.subr.bf16.mxu0 %v5111_v6  ;;  %3531 = vmatprep.subr.bf16.mxu1 %v5114_v7  ;;  %v5201_v6 = vld [vmem:[#allocation8 + $0x1e4] ss:$16 sps:$4 sm:$0xff]   ;;  %v5204_v7 = vld [vmem:[#allocation8 + $0x1ec] ss:$16 sps:$4 sm:$0xff]  }
 0x246   :  { %2547 = vmatmul.mubr.bf16.vlgmr.msra.gmra.mrb[4].mxu0 %v5630_v0  ;;  %2633 = vmatmul.mubr.bf16.vlgmr.msra.gmra.mrb[4].mxu1 %v5630_v0  ;;  %v5130_v0 = vld [vmem:[#allocation8 + $0x68] ss:$16 sps:$4 sm:$0xff]  }
 0x247   :  { %3446 = vmatpush1.bf16.msra.mxu0 %v5109_v8  ;;  %3532 = vmatpush1.bf16.msra.mxu1 %v5112_v9  ;;  %v5199_v8 = vld [vmem:[#allocation8 + $0x1e0] ss:$16 sps:$4 sm:$0xff]   ;;  %v5202_v9 = vld [vmem:[#allocation8 + $0x1e8] ss:$16 sps:$4 sm:$0xff]  }
 0x248   :  { %3447 = vmatprep.subr.bf16.mxu0 %v5117_v10  ;;  %3533 = vmatprep.subr.bf16.mxu1 %v5120_v11  ;;  %v5207_v10 = vld [vmem:[#allocation8 + $0x204] ss:$16 sps:$4 sm:$0xff]   ;;  %v5210_v11 = vld [vmem:[#allocation8 + $0x20c] ss:$16 sps:$4 sm:$0xff]  }
 0x24b   :  { %3448 = vmatpush1.bf16.msra.mxu0 %v5115_v12  ;;  %3534 = vmatpush1.bf16.msra.mxu1 %v5118_v13  ;;  %v1809_v12 = vld [vmem:[%s5671_s4] sm:$0xf] }
 0x24c   :  { %3449 = vmatprep.subr.bf16.mxu0 %v5123_v14  ;;  %3535 = vmatprep.subr.bf16.mxu1 %v5126_v15  ;;  %v1814_v13 = vrot.slane %v1809_v12, %v5615_v30  ;;  %v1822_v14 = vrot.slane %v1809_v12, %v5617_v31  ;;  %v1818_v15 = vrot.slane %v1809_v12, %v5622_v33 }
 0x24f   :  { %3450 = vmatpush1.bf16.msra.mxu0 %v5121_v16  ;;  %3536 = vmatpush1.bf16.msra.mxu1 %v5124_v17  ;;  %v1826_v16 = vrot.slane %v1809_v12, %v5624_v34  ;;  %v5252_v12 = vld [vmem:[#allocation8 + $0x2ec] ss:$16 sps:$4 sm:$0xff]  }
 0x250   :  { %3451 = vmatprep.subr.bf16.mxu0 %v5129_v18  ;;  %3537 = vmatprep.subr.bf16.mxu1 %v5132_v19 }
 0x253   :  { %3452 = vmatpush1.bf16.msra.mxu0 %v5127_v20  ;;  %3538 = vmatpush1.bf16.msra.mxu1 %v5130_v0 }
 0x254   :  { %3453 = vmatprep.subr.bf16.mxu0 %v5135_v21  ;;  %3539 = vmatprep.subr.bf16.mxu1 %v5138_v22 }
 0x257   :  { %3454 = vmatpush1.bf16.msra.mxu0 %v5133_v23  ;;  %3540 = vmatpush1.bf16.msra.mxu1 %v5136_v24 }
 0x258   :  { %3455 = vmatprep.subr.bf16.mxu0 %v5141_v25  ;;  %3541 = vmatprep.subr.bf16.mxu1 %v5144_v26 }
 0x25b   :  { %3456 = vmatpush1.bf16.msra.mxu0 %v5139_v27  ;;  %3542 = vmatpush1.bf16.msra.mxu1 %v5142_v28 }
 0x25c   :  { %3457 = vmatprep.subr.bf16.mxu0 %v5147_v29  ;;  %3543 = vmatprep.subr.bf16.mxu1 %v5150_v32 }
 0x25f   :  { %3458 = vmatpush1.bf16.msra.mxu0 %v5145_v35  ;;  %3544 = vmatpush1.bf16.msra.mxu1 %v5148_v36 }
 0x260   :  { %3459 = vmatprep.subr.bf16.mxu0 %v5153_v37  ;;  %3545 = vmatprep.subr.bf16.mxu1 %v5156_v38 }
 0x263   :  { %3460 = vmatpush1.bf16.msra.mxu0 %v5151_v39  ;;  %3546 = vmatpush1.bf16.msra.mxu1 %v5154_v40 }
 0x264   :  { %3461 = vmatprep.subr.bf16.mxu0 %v5159_v41  ;;  %3547 = vmatprep.subr.bf16.mxu1 %v5162_v42 }
 0x267   :  { %3462 = vmatpush1.bf16.msra.mxu0 %v5157_v43  ;;  %3548 = vmatpush1.bf16.msra.mxu1 %v5160_v44 }
 0x268   :  { %3463 = vmatprep.subr.bf16.mxu0 %v5165_v45  ;;  %3549 = vmatprep.subr.bf16.mxu1 %v5168_v46 }
 0x26b   :  { %3464 = vmatpush1.bf16.msra.mxu0 %v5163_v47  ;;  %3550 = vmatpush1.bf16.msra.mxu1 %v5166_v48  ;;  %v5205_v48 = vld [vmem:[#allocation8 + $0x200] ss:$16 sps:$4 sm:$0xff]  }
 0x26c   :  { %3465 = vmatprep.subr.bf16.mxu0 %v5171_v49  ;;  %3551 = vmatprep.subr.bf16.mxu1 %v5174_v50  ;;  %v5208_v49 = vld [vmem:[#allocation8 + $0x208] ss:$16 sps:$4 sm:$0xff]   ;;  %v5213_v50 = vld [vmem:[#allocation8 + $0x224] ss:$16 sps:$4 sm:$0xff]  }
 0x26f   :  { %3466 = vmatpush1.bf16.msra.mxu0 %v5169_v51  ;;  %3552 = vmatpush1.bf16.msra.mxu1 %v5172_v52  ;;  %v5216_v51 = vld [vmem:[#allocation8 + $0x22c] ss:$16 sps:$4 sm:$0xff]   ;;  %v5211_v52 = vld [vmem:[#allocation8 + $0x220] ss:$16 sps:$4 sm:$0xff]  }
 0x270   :  { %3467 = vmatprep.subr.bf16.mxu0 %v5177_v53  ;;  %3553 = vmatprep.subr.bf16.mxu1 %v5180_v54  ;;  %v5214_v53 = vld [vmem:[#allocation8 + $0x228] ss:$16 sps:$4 sm:$0xff]   ;;  %v5219_v54 = vld [vmem:[#allocation8 + $0x244] ss:$16 sps:$4 sm:$0xff]  }
 0x273   :  { %3468 = vmatpush1.bf16.msra.mxu0 %v5175_v55  ;;  %3554 = vmatpush1.bf16.msra.mxu1 %v5178_v56  ;;  %v5222_v55 = vld [vmem:[#allocation8 + $0x24c] ss:$16 sps:$4 sm:$0xff]   ;;  %v5217_v56 = vld [vmem:[#allocation8 + $0x240] ss:$16 sps:$4 sm:$0xff]  }
 0x274   :  { %3469 = vmatprep.subr.bf16.mxu0 %v5183_v57  ;;  %3555 = vmatprep.subr.bf16.mxu1 %v5186_v58  ;;  %v5220_v57 = vld [vmem:[#allocation8 + $0x248] ss:$16 sps:$4 sm:$0xff]   ;;  %v5225_v58 = vld [vmem:[#allocation8 + $0x264] ss:$16 sps:$4 sm:$0xff]  }
 0x277   :  { %3470 = vmatpush1.bf16.msra.mxu0 %v5181_v59  ;;  %3556 = vmatpush1.bf16.msra.mxu1 %v5184_v60  ;;  %v5228_v59 = vld [vmem:[#allocation8 + $0x26c] ss:$16 sps:$4 sm:$0xff]   ;;  %v5223_v60 = vld [vmem:[#allocation8 + $0x260] ss:$16 sps:$4 sm:$0xff]  }
 0x278   :  { %3471 = vmatprep.subr.bf16.mxu0 %v5189_v61  ;;  %3557 = vmatprep.subr.bf16.mxu1 %v5192_v62  ;;  %v5226_v61 = vld [vmem:[#allocation8 + $0x268] ss:$16 sps:$4 sm:$0xff]   ;;  %v5231_v62 = vld [vmem:[#allocation8 + $0x284] ss:$16 sps:$4 sm:$0xff]  }
 0x27b   :  { %3472 = vmatpush1.bf16.msra.mxu0 %v5187_v63  ;;  %3558 = vmatpush1.bf16.msra.mxu1 %v5190_v1  ;;  %v5234_v63 = vld [vmem:[#allocation8 + $0x28c] ss:$16 sps:$4 sm:$0xff]   ;;  %v5229_v1 = vld [vmem:[#allocation8 + $0x280] ss:$16 sps:$4 sm:$0xff]  }
 0x27c   :  { %3473 = vmatprep.subr.bf16.mxu0 %v5195_v2  ;;  %3559 = vmatprep.subr.bf16.mxu1 %v5198_v3  ;;  %v5232_v2 = vld [vmem:[#allocation8 + $0x288] ss:$16 sps:$4 sm:$0xff]   ;;  %v5237_v3 = vld [vmem:[#allocation8 + $0x2a4] ss:$16 sps:$4 sm:$0xff]  }
 0x27f   :  { %3474 = vmatpush1.bf16.msra.mxu0 %v5193_v4  ;;  %3560 = vmatpush1.bf16.msra.mxu1 %v5196_v5  ;;  %v5240_v4 = vld [vmem:[#allocation8 + $0x2ac] ss:$16 sps:$4 sm:$0xff]   ;;  %v5235_v5 = vld [vmem:[#allocation8 + $0x2a0] ss:$16 sps:$4 sm:$0xff]  }
 0x280   :  { %3475 = vmatprep.subr.bf16.mxu0 %v5201_v6  ;;  %3561 = vmatprep.subr.bf16.mxu1 %v5204_v7  ;;  %v5238_v6 = vld [vmem:[#allocation8 + $0x2a8] ss:$16 sps:$4 sm:$0xff]   ;;  %v5243_v7 = vld [vmem:[#allocation8 + $0x2c4] ss:$16 sps:$4 sm:$0xff]  }
 0x283   :  { %3476 = vmatpush1.bf16.msra.mxu0 %v5199_v8  ;;  %3562 = vmatpush1.bf16.msra.mxu1 %v5202_v9  ;;  %v5246_v8 = vld [vmem:[#allocation8 + $0x2cc] ss:$16 sps:$4 sm:$0xff]   ;;  %v5241_v9 = vld [vmem:[#allocation8 + $0x2c0] ss:$16 sps:$4 sm:$0xff]  }
 0x284   :  { %3488 = vmatprep.subr.bf16.mxu0 %v5207_v10  ;;  %3574 = vmatprep.subr.bf16.mxu1 %v5210_v11  ;;  %v5244_v10 = vld [vmem:[#allocation8 + $0x2c8] ss:$16 sps:$4 sm:$0xff]   ;;  %v5249_v11 = vld [vmem:[#allocation8 + $0x2e4] ss:$16 sps:$4 sm:$0xff]  }
 0x319   :  { %v2548_v17 = vpop.f32.mrb[4].mxu0  ;;  %v2634_v18 = vpop.f32.mrb[4].mxu1 }
 0x31a   :  { %v4552_v19 = vadd.f32 %v2548_v17, %v1814_v13  ;;  %v4556_v20 = vadd.f32 %v2634_v18, %v1822_v14  ;;  %v2550_v0 = vpop.f32.mrb[5].mxu0  ;;  %v2636_v21 = vpop.f32.mrb[5].mxu1  ;;  %v5253_v17 = vld [vmem:[#allocation8 + $0x300] ss:$16 sps:$4 sm:$0xff]   ;;  %v5256_v18 = vld [vmem:[#allocation8 + $0x308] ss:$16 sps:$4 sm:$0xff]  }
 0x31b   :  { %v4553_v22 = vadd.f32 %v2550_v0, %v1818_v15  ;;  %v4557_v23 = vadd.f32 %v2636_v21, %v1826_v16  ;;  %v2552_v24 = vpop.f32.mrb[6].mxu0  ;;  %v2638_v25 = vpop.f32.mrb[6].mxu1  ;;  %v5259_v0 = vld [vmem:[#allocation8 + $0x320] ss:$16 sps:$4 sm:$0xff]   ;;  %v5262_v21 = vld [vmem:[#allocation8 + $0x328] ss:$16 sps:$4 sm:$0xff]  }
 0x31c   :  { %v4554_v26 = vadd.f32 %v2552_v24, %v1814_v13  ;;  %v4558_v27 = vadd.f32 %v2638_v25, %v1822_v14  ;;  %v2554_v28 = vpop.f32.mrb[7].mxu0  ;;  %v2640_v29 = vpop.f32.mrb[7].mxu1  ;;  %v2643_v36 = vmax.f32 %v4552_v19, 0.0  ;;  %v2645_v37 = vmax.f32 %v4556_v20, 0.0  ;;  %v5247_v13 = vld [vmem:[#allocation8 + $0x2e0] ss:$16 sps:$4 sm:$0xff]  }
 0x31d   :  { %v4555_v32 = vadd.f32 %v2554_v28, %v1818_v15  ;;  %v4559_v35 = vadd.f32 %v2640_v29, %v1826_v16  ;;  %v2644_v40 = vmax.f32 %v4553_v22, 0.0  ;;  %v2646_v41 = vmax.f32 %v4557_v23, 0.0  ;;  %v5250_v14 = vld [vmem:[#allocation8 + $0x2e8] ss:$16 sps:$4 sm:$0xff]   ;;  %v5255_v15 = vld [vmem:[#allocation8 + $0x304] ss:$16 sps:$4 sm:$0xff]  }
 0x31e   :  { %v2647_v38 = vmax.f32 %v4554_v26, 0.0  ;;  %v2649_v39 = vmax.f32 %v4558_v27, 0.0  ;;  %v5258_v16 = vld [vmem:[#allocation8 + $0x30c] ss:$16 sps:$4 sm:$0xff]   ;;  %v5261_v19 = vld [vmem:[#allocation8 + $0x324] ss:$16 sps:$4 sm:$0xff]  }
 0x31f   :  { %v2648_v42 = vmax.f32 %v4555_v32, 0.0  ;;  %v2650_v43 = vmax.f32 %v4559_v35, 0.0  ;;  %v5264_v20 = vld [vmem:[#allocation8 + $0x32c] ss:$16 sps:$4 sm:$0xff]   ;;  %v5267_v22 = vld [vmem:[#allocation8 + $0x344] ss:$16 sps:$4 sm:$0xff]  }
 0x320   :  { %v2651_v44 = vpack.c.bf16 %v2647_v38, %v2643_v36  ;;  %v5641_v45 = vpack.c.bf16 %v2649_v39, %v2645_v37  ;;  %v5270_v23 = vld [vmem:[#allocation8 + $0x34c] ss:$16 sps:$4 sm:$0xff]   ;;  %v5265_v24 = vld [vmem:[#allocation8 + $0x340] ss:$16 sps:$4 sm:$0xff]   ;;  %v5268_v25 = vld [vmem:[#allocation8 + $0x348] ss:$16 sps:$4 sm:$0xff]  }
 0x321   :  { %v2652_v46 = vpack.c.bf16 %v2648_v42, %v2644_v40  ;;  %v2654_v47 = vpack.c.bf16 %v2650_v43, %v2646_v41  ;;  %v5273_v26 = vld [vmem:[#allocation8 + $0x364] ss:$16 sps:$4 sm:$0xff]   ;;  %v5276_v27 = vld [vmem:[#allocation8 + $0x36c] ss:$16 sps:$4 sm:$0xff]   ;;  %v5271_v28 = vld [vmem:[#allocation8 + $0x360] ss:$16 sps:$4 sm:$0xff]  }
 0x322   :  { %v5274_v29 = vld [vmem:[#allocation8 + $0x368] ss:$16 sps:$4 sm:$0xff]   ;;  %v5279_v32 = vld [vmem:[#allocation8 + $0x384] ss:$16 sps:$4 sm:$0xff]   ;;  %v5282_v35 = vld [vmem:[#allocation8 + $0x38c] ss:$16 sps:$4 sm:$0xff]  }
 0x323   :  { %3477 = vmatprep.mubr.bf16.mxu0 %v2652_v46  ;;  %3563 = vmatprep.mubr.bf16.mxu1 %v2652_v46  ;;  %v5277_v36 = vld [vmem:[#allocation8 + $0x380] ss:$16 sps:$4 sm:$0xff]   ;;  %v5280_v37 = vld [vmem:[#allocation8 + $0x388] ss:$16 sps:$4 sm:$0xff]   ;;  %v5285_v38 = vld [vmem:[#allocation8 + $0x3a4] ss:$16 sps:$4 sm:$0xff]  }
 0x324   :  { %3478 = vmatmul.mubr.bf16.vlgmr.msra.gmra.mrb[8].mxu0 %v2651_v44  ;;  %3564 = vmatmul.mubr.bf16.vlgmr.msra.gmra.mrb[8].mxu1 %v2651_v44  ;;  %v5288_v39 = vld [vmem:[#allocation8 + $0x3ac] ss:$16 sps:$4 sm:$0xff]   ;;  %v5283_v40 = vld [vmem:[#allocation8 + $0x3a0] ss:$16 sps:$4 sm:$0xff]   ;;  %v5286_v41 = vld [vmem:[#allocation8 + $0x3a8] ss:$16 sps:$4 sm:$0xff]  }
 0x325   :  { %3489 = vmatpush1.bf16.msra.mxu0 %v5205_v48  ;;  %3575 = vmatpush1.bf16.msra.mxu1 %v5208_v49  ;;  %v5291_v42 = vld [vmem:[#allocation8 + $0x3c4] ss:$16 sps:$4 sm:$0xff]   ;;  %v5294_v43 = vld [vmem:[#allocation8 + $0x3cc] ss:$16 sps:$4 sm:$0xff]   ;;  %v5289_v44 = vld [vmem:[#allocation8 + $0x3c0] ss:$16 sps:$4 sm:$0xff]  }
 0x326   :  { %3520 = vmatprep.mubr.bf16.mxu0 %v2654_v47  ;;  %3606 = vmatprep.mubr.bf16.mxu1 %v2654_v47  ;;  %v5292_v46 = vld [vmem:[#allocation8 + $0x3c8] ss:$16 sps:$4 sm:$0xff]   ;;  %v5297_v47 = vld [vmem:[#allocation8 + $0x3e4] ss:$16 sps:$4 sm:$0xff]   ;;  %v5300_v48 = vld [vmem:[#allocation8 + $0x3ec] ss:$16 sps:$4 sm:$0xff]  }
 0x327   :  { %3490 = vmatprep.subr.bf16.mxu0 %v5213_v50  ;;  %3576 = vmatprep.subr.bf16.mxu1 %v5216_v51  ;;  %v5295_v49 = vld [vmem:[#allocation8 + $0x3e0] ss:$16 sps:$4 sm:$0xff]   ;;  %v5298_v50 = vld [vmem:[#allocation8 + $0x3e8] ss:$16 sps:$4 sm:$0xff]  }
 0x328   :  { %v5301_v51 = vld [vmem:[#allocation10 + $0x40] sm:$0xff]  }
 0x329   :  { %3491 = vmatpush1.bf16.msra.mxu0 %v5211_v52  ;;  %3577 = vmatpush1.bf16.msra.mxu1 %v5214_v53  ;;  %v5302_v52 = vld [vmem:[#allocation10 + $0xc0] sm:$0xff]  }
 0x32a   :  { %3492 = vmatprep.subr.bf16.mxu0 %v5219_v54  ;;  %3578 = vmatprep.subr.bf16.mxu1 %v5222_v55  ;;  %v5303_v53 = vld [vmem:[#allocation10] sm:$0xff]   ;;  %v5305_v55 = vld [vmem:[#allocation10 + $0x48] sm:$0xff]  }
 0x32b   :  { %v5304_v54 = vld [vmem:[#allocation10 + $0x80] sm:$0xff]  }
 0x32d   :  { %3493 = vmatpush1.bf16.msra.mxu0 %v5217_v56  ;;  %3579 = vmatpush1.bf16.msra.mxu1 %v5220_v57  ;;  %v5306_v56 = vld [vmem:[#allocation10 + $0xc8] sm:$0xff]  }
 0x32e   :  { %3494 = vmatprep.subr.bf16.mxu0 %v5225_v58  ;;  %3580 = vmatprep.subr.bf16.mxu1 %v5228_v59  ;;  %v5307_v57 = vld [vmem:[#allocation10 + $0x8] sm:$0xff]   ;;  %v5309_v59 = vld [vmem:[#allocation10 + $0x50] sm:$0xff]  }
 0x32f   :  { %v5308_v58 = vld [vmem:[#allocation10 + $0x88] sm:$0xff]  }
 0x331   :  { %3495 = vmatpush1.bf16.msra.mxu0 %v5223_v60  ;;  %3581 = vmatpush1.bf16.msra.mxu1 %v5226_v61  ;;  %v5310_v60 = vld [vmem:[#allocation10 + $0xd0] sm:$0xff]  }
 0x332   :  { %3496 = vmatprep.subr.bf16.mxu0 %v5231_v62  ;;  %3582 = vmatprep.subr.bf16.mxu1 %v5234_v63  ;;  %v5311_v61 = vld [vmem:[#allocation10 + $0x10] sm:$0xff]   ;;  %v5313_v63 = vld [vmem:[#allocation10 + $0x58] sm:$0xff]  }
 0x333   :  { %v5312_v62 = vld [vmem:[#allocation10 + $0x90] sm:$0xff]  }
 0x335   :  { %3497 = vmatpush1.bf16.msra.mxu0 %v5229_v1  ;;  %3583 = vmatpush1.bf16.msra.mxu1 %v5232_v2  ;;  %v5314_v1 = vld [vmem:[#allocation10 + $0xd8] sm:$0xff]  }
 0x336   :  { %3498 = vmatprep.subr.bf16.mxu0 %v5237_v3  ;;  %3584 = vmatprep.subr.bf16.mxu1 %v5240_v4  ;;  %v5315_v2 = vld [vmem:[#allocation10 + $0x18] sm:$0xff]   ;;  %v5317_v3 = vld [vmem:[#allocation10 + $0x60] sm:$0xff]  }
 0x337   :  { %v5318_v4 = vld [vmem:[#allocation10 + $0xe0] sm:$0xff]  }
 0x339   :  { %3499 = vmatpush1.bf16.msra.mxu0 %v5235_v5  ;;  %3585 = vmatpush1.bf16.msra.mxu1 %v5238_v6  ;;  %v5319_v5 = vld [vmem:[#allocation10 + $0x20] sm:$0xff]  }
 0x33a   :  { %3500 = vmatprep.subr.bf16.mxu0 %v5243_v7  ;;  %3586 = vmatprep.subr.bf16.mxu1 %v5246_v8  ;;  %v5320_v6 = vld [vmem:[#allocation10 + $0xa0] sm:$0xff]   ;;  %v5321_v7 = vld [vmem:[#allocation10 + $0x68] sm:$0xff]  }
 0x33b   :  { %v5322_v8 = vld [vmem:[#allocation10 + $0xe8] sm:$0xff]  }
 0x33d   :  { %3501 = vmatpush1.bf16.msra.mxu0 %v5241_v9  ;;  %3587 = vmatpush1.bf16.msra.mxu1 %v5244_v10  ;;  %v5323_v9 = vld [vmem:[#allocation10 + $0x28] sm:$0xff]  }
 0x33e   :  { %3502 = vmatprep.subr.bf16.mxu0 %v5249_v11  ;;  %3588 = vmatprep.subr.bf16.mxu1 %v5252_v12  ;;  %v5324_v10 = vld [vmem:[#allocation10 + $0xa8] sm:$0xff]   ;;  %v5325_v11 = vld [vmem:[#allocation10 + $0x70] sm:$0xff]  }
 0x33f   :  { %v5326_v12 = vld [vmem:[#allocation10 + $0xf0] sm:$0xff]  }
 0x341   :  { %3503 = vmatpush1.bf16.msra.mxu0 %v5247_v13  ;;  %3589 = vmatpush1.bf16.msra.mxu1 %v5250_v14  ;;  %v5327_v13 = vld [vmem:[#allocation10 + $0x30] sm:$0xff]  }
 0x342   :  { %3504 = vmatprep.subr.bf16.mxu0 %v5255_v15  ;;  %3590 = vmatprep.subr.bf16.mxu1 %v5258_v16  ;;  %v5328_v14 = vld [vmem:[#allocation10 + $0xb0] sm:$0xff]   ;;  %v5329_v15 = vld [vmem:[#allocation10 + $0x78] sm:$0xff]  }
 0x343   :  { %v5330_v16 = vld [vmem:[#allocation10 + $0xf8] sm:$0xff]  }
 0x345   :  { %3505 = vmatpush1.bf16.msra.mxu0 %v5253_v17  ;;  %3591 = vmatpush1.bf16.msra.mxu1 %v5256_v18  ;;  %v5331_v17 = vld [vmem:[#allocation10 + $0x38] sm:$0xff]  }
 0x346   :  { %3506 = vmatprep.subr.bf16.mxu0 %v5261_v19  ;;  %3592 = vmatprep.subr.bf16.mxu1 %v5264_v20  ;;  %v5332_v18 = vld [vmem:[#allocation10 + $0xb8] sm:$0xff]   ;;  %v2783_v19 = vld [vmem:[%s5673_s6] sm:$0xf] }
 0x347   :  { %v2788_v20 = vrot.slane %v2783_v19, %v5615_v30 }
 0x349   :  { %3507 = vmatpush1.bf16.msra.mxu0 %v5259_v0  ;;  %3593 = vmatpush1.bf16.msra.mxu1 %v5262_v21  ;;  %v2796_v0 = vrot.slane %v2783_v19, %v5617_v31  ;;  %v2792_v21 = vrot.slane %v2783_v19, %v5622_v33 }
 0x34a   :  { %3508 = vmatprep.subr.bf16.mxu0 %v5267_v22  ;;  %3594 = vmatprep.subr.bf16.mxu1 %v5270_v23  ;;  %v2800_v22 = vrot.slane %v2783_v19, %v5624_v34 }
 0x34d   :  { %3509 = vmatpush1.bf16.msra.mxu0 %v5265_v24  ;;  %3595 = vmatpush1.bf16.msra.mxu1 %v5268_v25 }
 0x34e   :  { %3510 = vmatprep.subr.bf16.mxu0 %v5273_v26  ;;  %3596 = vmatprep.subr.bf16.mxu1 %v5276_v27 }
 0x351   :  { %3511 = vmatpush1.bf16.msra.mxu0 %v5271_v28  ;;  %3597 = vmatpush1.bf16.msra.mxu1 %v5274_v29 }
 0x352   :  { %3512 = vmatprep.subr.bf16.mxu0 %v5279_v32  ;;  %3598 = vmatprep.subr.bf16.mxu1 %v5282_v35 }
 0x355   :  { %3513 = vmatpush1.bf16.msra.mxu0 %v5277_v36  ;;  %3599 = vmatpush1.bf16.msra.mxu1 %v5280_v37 }
 0x356   :  { %3514 = vmatprep.subr.bf16.mxu0 %v5285_v38  ;;  %3600 = vmatprep.subr.bf16.mxu1 %v5288_v39 }
 0x359   :  { %3515 = vmatpush1.bf16.msra.mxu0 %v5283_v40  ;;  %3601 = vmatpush1.bf16.msra.mxu1 %v5286_v41 }
 0x35a   :  { %3516 = vmatprep.subr.bf16.mxu0 %v5291_v42  ;;  %3602 = vmatprep.subr.bf16.mxu1 %v5294_v43 }
 0x35d   :  { %3517 = vmatpush1.bf16.msra.mxu0 %v5289_v44  ;;  %3603 = vmatpush1.bf16.msra.mxu1 %v5292_v46 }
 0x35e   :  { %3518 = vmatprep.subr.bf16.mxu0 %v5297_v47  ;;  %3604 = vmatprep.subr.bf16.mxu1 %v5300_v48 }
 0x361   :  { %3519 = vmatpush1.bf16.msra.mxu0 %v5295_v49  ;;  %3605 = vmatpush1.bf16.msra.mxu1 %v5298_v50 }
 0x362   :  { %4500 = vmatprep.subr.bf16.mxu0 %v5301_v51  ;;  %4522 = vmatprep.subr.bf16.mxu1 %v5302_v52 }
 0x364   :  { %3521 = vmatmul.mubr.bf16.vlgmr.msra.gmra.mrb[8].mxu0 %v5641_v45  ;;  %3607 = vmatmul.mubr.bf16.vlgmr.msra.gmra.mrb[8].mxu1 %v5641_v45  ;;  %v5316_v45 = vld [vmem:[#allocation10 + $0x98] sm:$0xff]  }
 0x365   :  { %4501 = vmatpush3.bf16.msra.mxu0 %v5303_v53  ;;  %4523 = vmatpush3.bf16.msra.mxu1 %v5304_v54  ;;  %v4467_v54 = vld [vmem:[%s5675_s8] ss:$0 sm:$0xff]  ;;  %s5493_s8 = smov [#allocation11]  }
 0x366   :  { %4502 = vmatprep.subr.bf16.mxu0 %v5305_v55  ;;  %4524 = vmatprep.subr.bf16.mxu1 %v5306_v56  ;;  %s3999_s1 = sshll.u32 %s5493_s8, 4  ;;  %s4000_s1 = int_to_ptr.vmem [resolvable:$true] %s3999_s1 }
 0x367   :  { %s5451_s10 = scalar_lea.vmem %s4000_s1, 256  ;;  %p5456_p13 = scmp.lt.s32.totalorder %s4000_s1, %s4000_s1 }
 0x368   :  { %p5452_p12 = scmp.ne.s32.totalorder %s4000_s1, %s5451_s10  ;;  %p5457_p0 = scmp.lt.s32.totalorder %s5451_s10, %s5451_s10 }
 0x369   :  { %4503 = vmatpush3.bf16.msra.mxu0 %v5307_v57  ;;  %4525 = vmatpush3.bf16.msra.mxu1 %v5308_v58 }
 0x36a   :  { %4504 = vmatprep.subr.bf16.mxu0 %v5309_v59  ;;  %4526 = vmatprep.subr.bf16.mxu1 %v5310_v60  ;;  %p5458_p1 = por %p5457_p0, %p5456_p13 }
 0x36c   :  { %p5459_p2 = pnand %p5458_p1, %p5452_p12 }
 0x36d   :  { %4505 = vmatpush3.bf16.msra.mxu0 %v5311_v61  ;;  %4527 = vmatpush3.bf16.msra.mxu1 %v5312_v62 }
 0x36e   :  { %4506 = vmatprep.subr.bf16.mxu0 %v5313_v63  ;;  %4528 = vmatprep.subr.bf16.mxu1 %v5314_v1 }
 0x371   :  { %4507 = vmatpush3.bf16.msra.mxu0 %v5315_v2  ;;  %4529 = vmatpush3.bf16.msra.mxu1 %v5316_v45 }
 0x372   :  { %4508 = vmatprep.subr.bf16.mxu0 %v5317_v3  ;;  %4530 = vmatprep.subr.bf16.mxu1 %v5318_v4 }
 0x375   :  { %4509 = vmatpush3.bf16.msra.mxu0 %v5319_v5  ;;  %4531 = vmatpush3.bf16.msra.mxu1 %v5320_v6 }
 0x376   :  { %4510 = vmatprep.subr.bf16.mxu0 %v5321_v7  ;;  %4532 = vmatprep.subr.bf16.mxu1 %v5322_v8 }
 0x379   :  { %4511 = vmatpush3.bf16.msra.mxu0 %v5323_v9  ;;  %4533 = vmatpush3.bf16.msra.mxu1 %v5324_v10 }
 0x37a   :  { %4512 = vmatprep.subr.bf16.mxu0 %v5325_v11  ;;  %4534 = vmatprep.subr.bf16.mxu1 %v5326_v12 }
 0x37d   :  { %4513 = vmatpush3.bf16.msra.mxu0 %v5327_v13  ;;  %4535 = vmatpush3.bf16.msra.mxu1 %v5328_v14 }
 0x37e   :  { %4514 = vmatprep.subr.bf16.mxu0 %v5329_v15  ;;  %4536 = vmatprep.subr.bf16.mxu1 %v5330_v16 }
 0x381   :  { %4515 = vmatpush3.bf16.msra.mxu0 %v5331_v17  ;;  %4537 = vmatpush3.bf16.msra.mxu1 %v5332_v18 }
 0x437   :  { %v3522_v23 = vpop.f32.mrb[8].mxu0  ;;  %v3608_v24 = vpop.f32.mrb[8].mxu1 }
 0x438   :  { %v4560_v25 = vadd.f32 %v3522_v23, %v2788_v20  ;;  %v4564_v26 = vadd.f32 %v3608_v24, %v2796_v0  ;;  %v3524_v27 = vpop.f32.mrb[9].mxu0  ;;  %v3610_v28 = vpop.f32.mrb[9].mxu1 }
 0x439   :  { %v4561_v29 = vadd.f32 %v3524_v27, %v2792_v21  ;;  %v4565_v32 = vadd.f32 %v3610_v28, %v2800_v22  ;;  %v3526_v35 = vpop.f32.mrb[10].mxu0  ;;  %v3612_v36 = vpop.f32.mrb[10].mxu1 }
 0x43a   :  { %v4562_v37 = vadd.f32 %v3526_v35, %v2788_v20  ;;  %v4566_v38 = vadd.f32 %v3612_v36, %v2796_v0  ;;  %v3528_v39 = vpop.f32.mrb[11].mxu0  ;;  %v3614_v30 = vpop.f32.mrb[11].mxu1  ;;  %v3617_v41 = vmax.f32 %v4560_v25, 0.0  ;;  %v3619_v33 = vmax.f32 %v4564_v26, 0.0 }
 0x43b   :  { %v4563_v40 = vadd.f32 %v3528_v39, %v2792_v21  ;;  %v4567_v31 = vadd.f32 %v3614_v30, %v2800_v22  ;;  %v3618_v43 = vmax.f32 %v4561_v29, 0.0  ;;  %v3620_v44 = vmax.f32 %v4565_v32, 0.0 }
 0x43c   :  { %v3621_v42 = vmax.f32 %v4562_v37, 0.0  ;;  %v3623_v34 = vmax.f32 %v4566_v38, 0.0 }
 0x43d   :  { %v3622_v46 = vmax.f32 %v4563_v40, 0.0  ;;  %v3624_v47 = vmax.f32 %v4567_v31, 0.0 }
 0x43e   :  { %v3625_v48 = vpack.c.bf16 %v3621_v42, %v3617_v41  ;;  %v3627_v49 = vpack.c.bf16 %v3623_v34, %v3619_v33 }
 0x43f   :  { %v3626_v50 = vpack.c.bf16 %v3622_v46, %v3618_v43  ;;  %v3628_v51 = vpack.c.bf16 %v3624_v47, %v3620_v44 }
 0x441   :  { %3924 = vmatprep.mubr.bf16.mxu0 %v3626_v50  ;;  %3965 = vmatprep.mubr.bf16.mxu1 %v3628_v51 }
 0x442   :  { %3925 = vmatmul.mubr.bf16.vlgmr.msra.gmra.mrb[12].mxu0 %v3625_v48  ;;  %3966 = vmatmul.mubr.bf16.vlgmr.msra.gmra.mrb[12].mxu1 %v3627_v49 }
 0x515   :  { %v4516_v52 = vpop.f32.mrb[12].mxu0  ;;  %v4538_v53 = vpop.f32.mrb[12].mxu1 }
 0x516   :  { %v4517_v55 = vpop.f32.mrb[13].mxu0  ;;  %v4539_v56 = vpop.f32.mrb[13].mxu1 }
 0x517   :  { %v4518_v57 = vadd.f32 %v4517_v55, %v4516_v52  ;;  %v4540_v58 = vadd.f32 %v4539_v56, %v4538_v53  ;;  %v4519_v59 = vpop.f32.mrb[14].mxu0  ;;  %v4541_v60 = vpop.f32.mrb[14].mxu1 }
 0x518   :  { %v4520_v61 = vpop.f32.mrb[15].mxu0  ;;  %v4542_v62 = vpop.f32.mrb[15].mxu1 }
 0x519   :  { %v3927_v63 = vadd.f32 %v4518_v57, %v4467_v54  ;;  %v4521_v1 = vadd.f32 %v4520_v61, %v4519_v59  ;;  %v4543_v2 = vadd.f32 %v4542_v62, %v4541_v60 }
 0x51b   :  { %v3930_v45 = vadd.f32 %v4521_v1, %v4467_v54  ;;  %v3968_v3 = vadd.f32 %v4540_v58, %v3927_v63 }
 0x51d   :  { %3974 = vmax.xlane.f32.xlu0 %v3968_v3  ;;  %v3971_v4 = vadd.f32 %v4543_v2, %v3930_v45 }
 0x521   :  { %3976 = vmax.xlane.f32.xlu0 %v3971_v4 }
 0x5aa   :  { %v3975_v5 = vpop.xlane.xlu0 %3974 }
 0x5ab   :  { %v3978_v6 = vsub.f32 %v3968_v3, %v3975_v5 }
 0x5ad   :  { %v3980_v7 = vmul.f32 1.442695, %v3978_v6 }
 0x5ae   :  { %v3977_v8 = vpop.xlane.xlu0 %3976 }
 0x5af   :  { %5333 = vpow2.f32 %v3980_v7  ;;  %v3979_v9 = vsub.f32 %v3971_v4, %v3977_v8 }
 0x5b1   :  { %v3982_v10 = vmul.f32 1.442695, %v3979_v9 }
 0x5b3   :  { %5335 = vpow2.f32 %v3982_v10 }
 0x5b9   :  { %v5334_v11 = vpop.eup %5333 }
 0x5ba   :  { %3984 = vadd.xlane.f32.xlu1 %v5334_v11 }
 0x5bd   :  { %v5336_v12 = vpop.eup %5335 }
 0x5be   :  { %3986 = vadd.xlane.f32.xlu1 %v5336_v12 }
 0x647   :  { %v3985_v13 = vpop.xlane.xlu1 %3984 }
 0x648   :  { %5337 = vrcp.f32 %v3985_v13 }
 0x64b   :  { %v3987_v14 = vpop.xlane.xlu1 %3986 }
 0x64c   :  { %5339 = vrcp.f32 %v3987_v14 }
 0x652   :  { %v5338_v15 = vpop.eup %5337 }
 0x653   :  { %v3989_v16 = vmul.f32 %v5338_v15, %v5334_v11 }
 0x655   :  { %3992 = vst [vmem:[#allocation11] sm:$0xff] %v3989_v16 }
 0x656   :  { %v5340_v17 = vpop.eup %5339 }
 0x657   :  { %v3991_v18 = vmul.f32 %v5340_v17, %v5336_v12 }
 0x659   :  { %3993 = vst [vmem:[#allocation11 + $0x8] sm:$0xff] %v3991_v18 }
 0x65a   :  { %5462 = shalt.err (!%p5459_p2)
}
 0x65b   :  { %s5463_s16 = scalar_lea.hbm %s5676_s9, 256 }
 0x65c   :  { %p5464_p3 = scmp.ne.s32.totalorder %s5676_s9, %s5463_s16  ;;  %p5467_p4 = scmp.lt.u32.totalorder %s5463_s16, %s5676_s9 }
 0x65e   :  { %p5469_p5 = pnand %p5467_p4, %p5464_p3 }
 0x660   :  { %5472 = shalt.err (!%p5469_p5)
}
 0x661   :  { %s5494_s21 = smov 128   ;;  %s5495_s22 = smov 8  }
 0x662   :  { %4005 = dma.vmem_to_hbm [thread:$0]  %s4000_s1, 256, %s5676_s9, [#allocation4], %s5494_s21, %s5494_s21, %s5495_s22  }
 0x663   :  { %5479 = dma.done.wait [#allocation4], 256  }
 0x664   :  { %5480 = vsyncadd [#allocation4], 4294967040 }
 0x665   :  { %4009 = vsyncpa [#allocation3], 1 }
 0x666   :  { %4010 = vsyncpa [#allocation6], 1 }
 0x667   :  { %4011 = vsyncpa [#allocation9], 1 }
 0x668   :  { %4012 = vsyncpa [#allocation4], 1 }

</bundles_post_ra>
